<compile_context>
chip_gen: v7x
topology: tpu7x:2x2x1
jax: 0.10.0
libtpu: 0.0.40
codegen_flags: <defaults>
</compile_context>

<pallas_src>
import jax
import jax.numpy as jnp
from jax.experimental import pallas as pl
from jax.experimental.pallas import tpu as pltpu


def dueling_q_kernel(x_ref, w1_ref, b1_ref,
                     w2_ref, b2_ref,
                     wh_ref, bh_ref,
                     q_ref):
    # Shared trunk: bf16 into the MXU, f32 accumulation + f32 epilogue.
    f = jnp.maximum(
        jnp.dot(x_ref[...].astype(jnp.bfloat16), w1_ref[...],
                preferred_element_type=jnp.float32) + b1_ref[...], 0.0)

    # Fused value/advantage hidden layers: one [512, 1024] matmul, one ReLU.
    h = jnp.maximum(
        jnp.dot(f.astype(jnp.bfloat16), w2_ref[...],
                preferred_element_type=jnp.float32) + b2_ref[...], 0.0)

    # Fused heads: block-diagonal [2H, 1+A] weight -> [value | adv] in one
    # MXU call (N << 128 lanes, so the extra value column is free).
    heads = jnp.dot(h.astype(jnp.bfloat16), wh_ref[...],
                    preferred_element_type=jnp.float32) + bh_ref[...]

    value = heads[:, :1]
    adv = heads[:, 1:]

    # Dueling combination: q = V + (A - mean_a A)
    q_ref[...] = (value + adv - jnp.mean(adv, axis=1, keepdims=True)
                  ).astype(q_ref.dtype)


def _round_up(x, m):
    return ((x + m - 1) // m) * m


def _pick_batch_tile(B):
    """Batch tile: full batch for tiny B; >=2 grid steps for medium B so both
    v7x TensorCores are used; capped at 1024 rows (~12 MiB VMEM footprint,
    well under the default scoped limit on v5e/v6e/v7x)."""
    if B <= 64:
        return B                                  # single step; full dim OK
    if B <= 2048:
        return min(1024, _round_up((B + 1) // 2, 8))   # 2 steps, sublane-aligned
    return 1024


def policy_forward(x, p):
    """x: [B, S] float32; p: packed params dict (see pack_params)."""
    B, S = x.shape
    A = p["b_head"].shape[1] - 1

    TB = _pick_batch_tile(B)
    grid = (pl.cdiv(B, TB),)

    batch_map = lambda i: (i, 0)
    const_map = lambda i: (0, 0)   # weights: block index never changes -> resident

    args = (x, p["w1"], p["b1"], p["w2"], p["b2"], p["w_head"], p["b_head"])

    in_specs = [pl.BlockSpec((TB, S), batch_map)]
    in_specs += [pl.BlockSpec(a.shape, const_map) for a in args[1:]]

    return pl.pallas_call(
        dueling_q_kernel,
        out_shape=jax.ShapeDtypeStruct((B, A), jnp.float32),
        grid=grid,
        in_specs=in_specs,
        out_specs=pl.BlockSpec((TB, A), batch_map),
        compiler_params=pltpu.CompilerParams(
            dimension_semantics=("parallel",)),
    )(*args)


def init_params(key, state_space_size, action_space_size, hidden_size=512):
    """Init matching Policy.weight_init:
       weight ~ Normal(0, sqrt(2/(fan_in+fan_out))); bias ~ U(-1/sqrt(fan_in), 1/sqrt(fan_in))."""
    def linear(k, fan_in, fan_out):
        kw, kb = jax.random.split(k)
        std = jnp.sqrt(2.0 / (fan_in + fan_out))
        w = std * jax.random.normal(kw, (fan_in, fan_out), dtype=jnp.float32)
        bound = 1.0 / jnp.sqrt(fan_in)
        b = jax.random.uniform(kb, (1, fan_out), minval=-bound, maxval=bound,
                               dtype=jnp.float32)
        return w, b

    k1, k2, k3, k4, k5 = jax.random.split(key, 5)
    w1, b1 = linear(k1, state_space_size, hidden_size)
    wv2, bv2 = linear(k2, hidden_size, hidden_size)
    wv, bv = linear(k3, hidden_size, 1)
    wa2, ba2 = linear(k4, hidden_size, hidden_size)
    wa, ba = linear(k5, hidden_size, action_space_size)
    return dict(w1=w1, b1=b1, wv2=wv2, bv2=bv2, wv=wv, bv=bv,
                wa2=wa2, ba2=ba2, wa=wa, ba=ba)


def pack_params(p):
    """Pack raw params into the kernel layout:
       - bf16 matmul weights (MXU input dtype, halves HBM weight traffic)
       - f32 biases
       - fused hidden-layer weight  [H, 2H]   = [wv2 | wa2]
       - fused block-diag head      [2H, 1+A] = [[wv, 0], [0, wa]], b = [bv | ba]."""
    H = p["wv2"].shape[0]
    A = p["wa"].shape[1]

    w_head = jnp.zeros((2 * H, 1 + A), dtype=jnp.float32)
    w_head = w_head.at[:H, :1].set(p["wv"])
    w_head = w_head.at[H:, 1:].set(p["wa"])

    return dict(
        w1=p["w1"].astype(jnp.bfloat16),
        b1=p["b1"],
        w2=jnp.concatenate([p["wv2"], p["wa2"]], axis=1).astype(jnp.bfloat16),
        b2=jnp.concatenate([p["bv2"], p["ba2"]], axis=1),
        w_head=w_head.astype(jnp.bfloat16),
        b_head=jnp.concatenate([p["bv"], p["ba"]], axis=1),
    )


def policy_forward_ref(x, pk):
    """Pure-JAX reference mirroring the kernel numerics exactly
    (bf16-rounded weights AND activations, f32 accumulation)."""
    f32 = jnp.float32
    bf = jnp.bfloat16
    w1 = pk["w1"].astype(f32)
    w2 = pk["w2"].astype(f32)
    wh = pk["w_head"].astype(f32)
    f = jax.nn.relu(x.astype(bf).astype(f32) @ w1 + pk["b1"])
    h = jax.nn.relu(f.astype(bf).astype(f32) @ w2 + pk["b2"])
    heads = h.astype(bf).astype(f32) @ wh + pk["b_head"]
    value, adv = heads[:, :1], heads[:, 1:]
    return value + adv - adv.mean(axis=1, keepdims=True)


if __name__ == "__main__":
    STATE, ACTION, BATCH = 16, 8, 2

    key = jax.random.PRNGKey(0)
    k_params, k_x = jax.random.split(key)
    raw = init_params(k_params, STATE, ACTION)
    packed = pack_params(raw)
    x = jax.random.normal(k_x, (BATCH, STATE), dtype=jnp.float32)

    q = policy_forward(x, packed)
    q = jax.block_until_ready(q)

    q_ref = policy_forward_ref(x, packed)
    assert q.shape == (BATCH, ACTION)
    assert jnp.allclose(q, q_ref, atol=1e-2, rtol=1e-2), "mismatch vs JAX reference"

    print("KERNEL_OK")
</pallas_src>

<mosaic_0001>
module attributes {stable_mosaic.version = 11 : i64} {
  func.func @dueling_q_kernel(%arg0: i32, %arg1: memref<2x16xf32, #tpu.memory_space<vmem>>, %arg2: memref<16x512xbf16, #tpu.memory_space<vmem>>, %arg3: memref<1x512xf32, #tpu.memory_space<vmem>>, %arg4: memref<512x1024xbf16, #tpu.memory_space<vmem>>, %arg5: memref<1x1024xf32, #tpu.memory_space<vmem>>, %arg6: memref<1024x9xbf16, #tpu.memory_space<vmem>>, %arg7: memref<1x9xf32, #tpu.memory_space<vmem>>, %arg8: memref<2x8xf32, #tpu.memory_space<vmem>>) attributes {dimension_semantics = [#tpu.dimension_semantics<parallel>], iteration_bounds = array<i64: 1>, scalar_prefetch = 0 : i64, scratch_operands = 0 : i64, tpu.core_type = #tpu.core_type<tc>, window_params = [{transform_indices = @transform_0, window_bounds = array<i64: 2, 16>}, {pipeline_mode = #tpu.pipeline_mode<synchronous>, transform_indices = @transform_1, window_bounds = array<i64: 16, 512>}, {pipeline_mode = #tpu.pipeline_mode<synchronous>, transform_indices = @transform_2, window_bounds = array<i64: 1, 512>}, {pipeline_mode = #tpu.pipeline_mode<synchronous>, transform_indices = @transform_3, window_bounds = array<i64: 512, 1024>}, {pipeline_mode = #tpu.pipeline_mode<synchronous>, transform_indices = @transform_4, window_bounds = array<i64: 1, 1024>}, {pipeline_mode = #tpu.pipeline_mode<synchronous>, transform_indices = @transform_5, window_bounds = array<i64: 1024, 9>}, {pipeline_mode = #tpu.pipeline_mode<synchronous>, transform_indices = @transform_6, window_bounds = array<i64: 1, 9>}, {transform_indices = @transform_7, window_bounds = array<i64: 2, 8>}]} {
    %c0 = arith.constant 0 : index
    %c0_0 = arith.constant 0 : index
    %0 = vector.load %arg1[%c0, %c0_0] : memref<2x16xf32, #tpu.memory_space<vmem>>, vector<2x16xf32>
    %1 = arith.truncf %0 : vector<2x16xf32> to vector<2x16xbf16>
    %c0_1 = arith.constant 0 : index
    %c0_2 = arith.constant 0 : index
    %2 = vector.load %arg2[%c0_1, %c0_2] : memref<16x512xbf16, #tpu.memory_space<vmem>>, vector<16x512xbf16>
    %cst = arith.constant dense<0.000000e+00> : vector<2x512xf32>
    %3 = tpu.matmul %1, %2, %cst {dimension_numbers = #tpu.dot_dimension_numbers<[1], [0], [0], [1], [0, 0, 1, 1], [], []>} : vector<2x16xbf16>, vector<16x512xbf16>, vector<2x512xf32> -> vector<2x512xf32>
    %c0_3 = arith.constant 0 : index
    %c0_4 = arith.constant 0 : index
    %4 = vector.load %arg3[%c0_3, %c0_4] : memref<1x512xf32, #tpu.memory_space<vmem>>, vector<1x512xf32>
    %5 = vector.broadcast %4 : vector<1x512xf32> to vector<2x512xf32>
    %6 = arith.addf %3, %5 : vector<2x512xf32>
    %cst_5 = arith.constant 0.000000e+00 : f32
    %7 = vector.broadcast %cst_5 : f32 to vector<2x512xf32>
    %8 = arith.maximumf %6, %7 : vector<2x512xf32>
    %9 = arith.truncf %8 : vector<2x512xf32> to vector<2x512xbf16>
    %c0_6 = arith.constant 0 : index
    %c0_7 = arith.constant 0 : index
    %10 = vector.load %arg4[%c0_6, %c0_7] : memref<512x1024xbf16, #tpu.memory_space<vmem>>, vector<512x1024xbf16>
    %cst_8 = arith.constant dense<0.000000e+00> : vector<2x1024xf32>
    %11 = tpu.matmul %9, %10, %cst_8 {dimension_numbers = #tpu.dot_dimension_numbers<[1], [0], [0], [1], [0, 0, 1, 1], [], []>} : vector<2x512xbf16>, vector<512x1024xbf16>, vector<2x1024xf32> -> vector<2x1024xf32>
    %c0_9 = arith.constant 0 : index
    %c0_10 = arith.constant 0 : index
    %12 = vector.load %arg5[%c0_9, %c0_10] : memref<1x1024xf32, #tpu.memory_space<vmem>>, vector<1x1024xf32>
    %13 = vector.broadcast %12 : vector<1x1024xf32> to vector<2x1024xf32>
    %14 = arith.addf %11, %13 : vector<2x1024xf32>
    %cst_11 = arith.constant 0.000000e+00 : f32
    %15 = vector.broadcast %cst_11 : f32 to vector<2x1024xf32>
    %16 = arith.maximumf %14, %15 : vector<2x1024xf32>
    %17 = arith.truncf %16 : vector<2x1024xf32> to vector<2x1024xbf16>
    %c0_12 = arith.constant 0 : index
    %c0_13 = arith.constant 0 : index
    %18 = vector.load %arg6[%c0_12, %c0_13] : memref<1024x9xbf16, #tpu.memory_space<vmem>>, vector<1024x9xbf16>
    %cst_14 = arith.constant dense<0.000000e+00> : vector<2x9xf32>
    %19 = tpu.matmul %17, %18, %cst_14 {dimension_numbers = #tpu.dot_dimension_numbers<[1], [0], [0], [1], [0, 0, 1, 1], [], []>} : vector<2x1024xbf16>, vector<1024x9xbf16>, vector<2x9xf32> -> vector<2x9xf32>
    %c0_15 = arith.constant 0 : index
    %c0_16 = arith.constant 0 : index
    %20 = vector.load %arg7[%c0_15, %c0_16] : memref<1x9xf32, #tpu.memory_space<vmem>>, vector<1x9xf32>
    %21 = vector.broadcast %20 : vector<1x9xf32> to vector<2x9xf32>
    %22 = arith.addf %19, %21 : vector<2x9xf32>
    %23 = vector.extract_strided_slice %22 {offsets = [0, 0], sizes = [2, 1], strides = [1, 1]} : vector<2x9xf32> to vector<2x1xf32>
    %24 = vector.extract_strided_slice %22 {offsets = [0, 1], sizes = [2, 8], strides = [1, 1]} : vector<2x9xf32> to vector<2x8xf32>
    %25 = vector.broadcast %23 : vector<2x1xf32> to vector<2x8xf32>
    %26 = arith.addf %25, %24 : vector<2x8xf32>
    %cst_17 = arith.constant dense<0.000000e+00> : vector<2xf32>
    %27 = vector.multi_reduction <add>, %24, %cst_17 [1] : vector<2x8xf32> to vector<2xf32>
    %28 = vector.shape_cast %27 : vector<2xf32> to vector<2x1xf32>
    %cst_18 = arith.constant 8.000000e+00 : f32
    %29 = vector.broadcast %cst_18 : f32 to vector<2x1xf32>
    %30 = arith.divf %28, %29 : vector<2x1xf32>
    %31 = vector.broadcast %30 : vector<2x1xf32> to vector<2x8xf32>
    %32 = arith.subf %26, %31 : vector<2x8xf32>
    %c0_19 = arith.constant 0 : index
    %c0_20 = arith.constant 0 : index
    %33 = vector.load %arg8[%c0_19, %c0_20] : memref<2x8xf32, #tpu.memory_space<vmem>>, vector<2x8xf32>
    tpu.vector_store %arg8[%c0_19, %c0_20], %32 {strides = array<i32>} : memref<2x8xf32, #tpu.memory_space<vmem>>, vector<2x8xf32>,
    return
  }
  func.func @transform_0(%arg0: i32) -> (i32, i32) {
    %c0_i32 = arith.constant 0 : i32
    %c0_i32_0 = arith.constant 0 : i32
    return %arg0, %c0_i32 : i32, i32
  }
  func.func @transform_1(%arg0: i32) -> (i32, i32) {
    %c0_i32 = arith.constant 0 : i32
    %c0_i32_0 = arith.constant 0 : i32
    %c0_i32_1 = arith.constant 0 : i32
    return %c0_i32, %c0_i32_0 : i32, i32
  }
  func.func @transform_2(%arg0: i32) -> (i32, i32) {
    %c0_i32 = arith.constant 0 : i32
    %c0_i32_0 = arith.constant 0 : i32
    %c0_i32_1 = arith.constant 0 : i32
    return %c0_i32, %c0_i32_0 : i32, i32
  }
  func.func @transform_3(%arg0: i32) -> (i32, i32) {
    %c0_i32 = arith.constant 0 : i32
    %c0_i32_0 = arith.constant 0 : i32
    %c0_i32_1 = arith.constant 0 : i32
    return %c0_i32, %c0_i32_0 : i32, i32
  }
  func.func @transform_4(%arg0: i32) -> (i32, i32) {
    %c0_i32 = arith.constant 0 : i32
    %c0_i32_0 = arith.constant 0 : i32
    %c0_i32_1 = arith.constant 0 : i32
    return %c0_i32, %c0_i32_0 : i32, i32
  }
  func.func @transform_5(%arg0: i32) -> (i32, i32) {
    %c0_i32 = arith.constant 0 : i32
    %c0_i32_0 = arith.constant 0 : i32
    %c0_i32_1 = arith.constant 0 : i32
    return %c0_i32, %c0_i32_0 : i32, i32
  }
  func.func @transform_6(%arg0: i32) -> (i32, i32) {
    %c0_i32 = arith.constant 0 : i32
    %c0_i32_0 = arith.constant 0 : i32
    %c0_i32_1 = arith.constant 0 : i32
    return %c0_i32, %c0_i32_0 : i32, i32
  }
  func.func @transform_7(%arg0: i32) -> (i32, i32) {
    %c0_i32 = arith.constant 0 : i32
    %c0_i32_0 = arith.constant 0 : i32
    return %arg0, %c0_i32 : i32, i32
  }
}

</mosaic_0001>

<bundles_post_ra>
// kernel: tpu_custom_call.1
= control target key start
LH: loop header
LB: loop body
LE: loop exit
PB: predicated region body
PF: predicated region fallthrough
CT: control target
= control target key end

     0   :  { %12 = vsyncpa [#allocation3], 0  ;;  %s3743_s0 = inlined_call_operand.vmem [shape: f32[2,16], index: 0, kind: input, shape index: {}]   ;;  %s3744_s1 = inlined_call_operand.vmem [shape: bf16[16,512], index: 1, kind: input, shape index: {}]   ;;  %s3745_s2 = inlined_call_operand.vmem [shape: f32[1,512], index: 2, kind: input, shape index: {}]   ;;  %s3746_s3 = inlined_call_operand.hbm [shape: bf16[512,1024], index: 3, kind: input, shape index: {}]   ;;  %s3747_s4 = inlined_call_operand.vmem [shape: f32[1,1024], index: 4, kind: input, shape index: {}]   ;;  %s3748_s5 = inlined_call_operand.vmem [shape: bf16[1024,9], index: 5, kind: input, shape index: {}]   ;;  %s3749_s6 = inlined_call_operand.vmem [shape: f32[1,9], index: 6, kind: input, shape index: {}]   ;;  %s3750_s7 = inlined_call_operand.hbm [shape: f32[2,8], index: 7, kind: output, shape index: {}]  }
   0x1   :  { %13 = vsyncpa [#allocation4], 0  ;;  %s3386_s24 = smov [#allocation2]   ;;  %s3338_s28 = scalar_lea.hbm %s3746_s3, 32768 }
   0x2   :  { %s25_s25 = sshll.u32 %s3386_s24, 4  ;;  %p3339_p0 = scmp.ne.s32.totalorder %s3746_s3, %s3338_s28  ;;  %s26_s25 = int_to_ptr.vmem [resolvable:$true] %s25_s25 }
   0x3   :  { %p3342_p1 = scmp.lt.u32.totalorder %s3338_s28, %s3746_s3 }
   0x5   :  { %p3344_p2 = pnand %p3342_p1, %p3339_p0 }
   0x7   :  { %3347 = shalt.err (!%p3344_p2)
}
   0x8   :  { %s3348_s10 = scalar_lea.vmem %s26_s25, 32768  ;;  %p3353_p4 = scmp.lt.s32.totalorder %s26_s25, %s26_s25 }
   0x9   :  { %p3349_p3 = scmp.ne.s32.totalorder %s26_s25, %s3348_s10  ;;  %p3354_p5 = scmp.lt.s32.totalorder %s3348_s10, %s3348_s10 }
   0xb   :  { %p3355_p6 = por %p3354_p5, %p3353_p4 }
   0xd   :  { %p3356_p7 = pnand %p3355_p6, %p3349_p3 }
   0xf   :  { %3359 = shalt.err (!%p3356_p7)
}
  0x10   :  { %s3387_s11 = smov 512   ;;  %s3388_s12 = smov 32  }
  0x11   :  { %31 = dma.hbm_to_vmem [thread:$0]  %s3746_s3, 32768, %s26_s25, [#allocation3], %s3387_s11, %s3387_s11, %s3388_s12  }
  0x12   :  { %3382 = dma.done.wait [#allocation3], 32768  }
  0x13   :  { %3383 = vsyncadd [#allocation3], 4294934528  ;;  %v3389_v0 = vmov 0   ;;  %v3268_v1 = vld [vmem:[%s3744_s1 + $0x4] ss:$16 sps:$4 sm:$0xff]   ;;  %vm90_vm0 = vcmask 130048  }
  0x14   :  { %126 = vmatprep.mubr.bf16.mxu0 %v3389_v0  ;;  %167 = vmatprep.mubr.bf16.mxu1 %v3389_v0  ;;  %v3270_v2 = vld [vmem:[%s3744_s1] ss:$16 sps:$4 sm:$0xff]   ;;  %v3271_v5 = vld [vmem:[%s3744_s1 + $0xc] ss:$16 sps:$4 sm:$0xff]   ;;  %v3273_v6 = vld [vmem:[%s3744_s1 + $0x8] ss:$16 sps:$4 sm:$0xff]  }
  0x15   :  { %3266 = vset.pattern.permute.xlu1 %v3389_v0  ;;  %3267 = vset.pattern.permute.xlu0 %v3389_v0  ;;  %v42_v3 = vld [vmem:[%s3743_s0] sm:$0x3]  ;;  %v185_v9 = vld [vmem:[#allocation2 + $0x8] sm:$0xff]  ;;  %vm2794_vm1 = vcmask 58368   ;;  %s3391_s20 = smov [#allocation5]  }
  0x16   :  { %94 = vmatprep.subr.bf16.mxu0 %v3268_v1  ;;  %v43_v4 = vpack.c.bf16 %v42_v3, %v42_v3  ;;  %v184_v7 = vld [vmem:[#allocation2] sm:$0xff]  ;;  %135 = vmatprep.subr.bf16.mxu1 %v3271_v5  ;;  %v189_v12 = vld [vmem:[#allocation2 + $0x28] sm:$0xff]  ;;  %s2812_s3 = sshll.u32 %s3391_s20, 4  ;;  %s2813_s3 = int_to_ptr.vmem [resolvable:$true] %s2812_s3 }
  0x17   :  { %95 = vmatpush1.bf16.msra.mxu0 %v3270_v2  ;;  %v188_v8 = vld [vmem:[#allocation2 + $0x20] sm:$0xff]  ;;  %136 = vmatpush1.bf16.msra.mxu1 %v3273_v6  ;;  %v2829_v15 = vcombine.low %v185_v9, %v189_v12  ;;  %v2830_v16 = vcombine.high %v185_v9, %v189_v12  ;;  %v193_v18 = vld [vmem:[#allocation2 + $0x48] sm:$0xff]  ;;  %s3360_s21 = scalar_lea.vmem %s2813_s3, 32  ;;  %p3365_p9 = scmp.lt.s32.totalorder %s2813_s3, %s2813_s3 }
  0x18   :  { %v2827_v10 = vcombine.low %v184_v7, %v188_v8  ;;  %v2828_v11 = vcombine.high %v184_v7, %v188_v8  ;;  %v192_v13 = vld [vmem:[#allocation2 + $0x40] sm:$0xff]  ;;  %v197_v19 = vld [vmem:[#allocation2 + $0x68] sm:$0xff]  ;;  %p3361_p8 = scmp.ne.s32.totalorder %s2813_s3, %s3360_s21  ;;  %p3366_p10 = scmp.lt.s32.totalorder %s3360_s21, %s3360_s21 }
  0x19   :  { %v196_v14 = vld [vmem:[#allocation2 + $0x60] sm:$0xff]  ;;  %v2838_v21 = vcombine.high %v193_v18, %v197_v19  ;;  %1844 = vmatprep.subr.bf16.mxu1 %v2830_v16  ;;  %v201_v24 = vld [vmem:[#allocation2 + $0x88] sm:$0xff]  ;;  %v2837_v27 = vcombine.low %v193_v18, %v197_v19 }
  0x1a   :  { %v2836_v17 = vcombine.high %v192_v13, %v196_v14  ;;  %v200_v20 = vld [vmem:[#allocation2 + $0x80] sm:$0xff]  ;;  %2825 = vmatmul.mubr.msk.bf16.vlgmr.msra.gmra.mrb[0].mxu0 %vm90_vm0, %v43_v4  ;;  %1762 = vmatprep.subr.bf16.mxu0 %v2828_v11  ;;  %v2835_v23 = vcombine.low %v192_v13, %v196_v14  ;;  %v205_v25 = vld [vmem:[#allocation2 + $0xa8] sm:$0xff]  ;;  %p3367_p11 = por %p3366_p10, %p3365_p9 }
  0x1b   :  { %v204_v22 = vld [vmem:[#allocation2 + $0xa0] sm:$0xff]  ;;  %1763 = vmatpush1.bf16.msra.mxu0 %v2827_v10  ;;  %2826 = vmatmul.mubr.msk.bf16.vlgmr.msra.gmra.mrb[0].mxu1 %vm90_vm0, %v43_v4  ;;  %v2846_v30 = vcombine.high %v201_v24, %v205_v25  ;;  %v209_v32 = vld [vmem:[#allocation2 + $0xc8] sm:$0xff]  ;;  %v2845_v35 = vcombine.low %v201_v24, %v205_v25 }
  0x1c   :  { %1764 = vmatprep.subr.bf16.mxu0 %v2836_v17  ;;  %v2844_v26 = vcombine.high %v200_v20, %v204_v22  ;;  %1845 = vmatpush1.bf16.msra.mxu1 %v2829_v15  ;;  %v208_v28 = vld [vmem:[#allocation2 + $0xc0] sm:$0xff]  ;;  %v2843_v31 = vcombine.low %v200_v20, %v204_v22  ;;  %v213_v33 = vld [vmem:[#allocation2 + $0xe8] sm:$0xff]  ;;  %p3368_p12 = pnand %p3367_p11, %p3361_p8 }
  0x1d   :  { %v212_v29 = vld [vmem:[#allocation2 + $0xe0] sm:$0xff]  ;;  %1846 = vmatprep.subr.bf16.mxu1 %v2838_v21  ;;  %v2854_v38 = vcombine.high %v209_v32, %v213_v33  ;;  %v217_v40 = vld [vmem:[#allocation2 + $0x108] sm:$0xff]  ;;  %v2853_v43 = vcombine.low %v209_v32, %v213_v33 }
  0x1e   :  { %v2852_v34 = vcombine.high %v208_v28, %v212_v29  ;;  %v216_v36 = vld [vmem:[#allocation2 + $0x100] sm:$0xff]  ;;  %v2851_v39 = vcombine.low %v208_v28, %v212_v29  ;;  %v221_v41 = vld [vmem:[#allocation2 + $0x128] sm:$0xff] }
  0x1f   :  { %1765 = vmatpush1.bf16.msra.mxu0 %v2835_v23  ;;  %v220_v37 = vld [vmem:[#allocation2 + $0x120] sm:$0xff]  ;;  %v2862_v46 = vcombine.high %v217_v40, %v221_v41  ;;  %v225_v48 = vld [vmem:[#allocation2 + $0x148] sm:$0xff]  ;;  %v2861_v52 = vcombine.low %v217_v40, %v221_v41 }
  0x20   :  { %1766 = vmatprep.subr.bf16.mxu0 %v2844_v26  ;;  %1847 = vmatpush1.bf16.msra.mxu1 %v2837_v27  ;;  %v2860_v42 = vcombine.high %v216_v36, %v220_v37  ;;  %v224_v44 = vld [vmem:[#allocation2 + $0x140] sm:$0xff]  ;;  %v2859_v47 = vcombine.low %v216_v36, %v220_v37  ;;  %v229_v49 = vld [vmem:[#allocation2 + $0x168] sm:$0xff] }
  0x21   :  { %1848 = vmatprep.subr.bf16.mxu1 %v2846_v30  ;;  %v228_v45 = vld [vmem:[#allocation2 + $0x160] sm:$0xff]  ;;  %v233_v54 = vld [vmem:[#allocation2 + $0x188] sm:$0xff]  ;;  %v2870_v56 = vcombine.high %v225_v48, %v229_v49  ;;  %v2869_v61 = vcombine.low %v225_v48, %v229_v49 }
  0x22   :  { %v2868_v50 = vcombine.high %v224_v44, %v228_v45  ;;  %v232_v51 = vld [vmem:[#allocation2 + $0x180] sm:$0xff]  ;;  %v237_v55 = vld [vmem:[#allocation2 + $0x1a8] sm:$0xff]  ;;  %v2867_v57 = vcombine.low %v224_v44, %v228_v45 }
  0x23   :  { %1767 = vmatpush1.bf16.msra.mxu0 %v2843_v31  ;;  %v236_v53 = vld [vmem:[#allocation2 + $0x1a0] sm:$0xff]  ;;  %v241_v62 = vld [vmem:[#allocation2 + $0x1c8] sm:$0xff]  ;;  %v2878_v0 = vcombine.high %v233_v54, %v237_v55  ;;  %v2877_v5 = vcombine.low %v233_v54, %v237_v55 }
  0x24   :  { %1768 = vmatprep.subr.bf16.mxu0 %v2852_v34  ;;  %1849 = vmatpush1.bf16.msra.mxu1 %v2845_v35  ;;  %v240_v58 = vld [vmem:[#allocation2 + $0x1c0] sm:$0xff]  ;;  %v2876_v60 = vcombine.high %v232_v51, %v236_v53  ;;  %v245_v63 = vld [vmem:[#allocation2 + $0x1e8] sm:$0xff]  ;;  %v2875_v1 = vcombine.low %v232_v51, %v236_v53 }
  0x25   :  { %1850 = vmatprep.subr.bf16.mxu1 %v2854_v38  ;;  %v244_v59 = vld [vmem:[#allocation2 + $0x1e0] sm:$0xff]  ;;  %v249_v6 = vld [vmem:[#allocation2 + $0x208] sm:$0xff]  ;;  %v2886_v8 = vcombine.high %v241_v62, %v245_v63  ;;  %v2885_v13 = vcombine.low %v241_v62, %v245_v63 }
  0x26   :  { %v248_v2 = vld [vmem:[#allocation2 + $0x200] sm:$0xff]  ;;  %v2884_v4 = vcombine.high %v240_v58, %v244_v59  ;;  %v253_v7 = vld [vmem:[#allocation2 + $0x228] sm:$0xff]  ;;  %v2883_v9 = vcombine.low %v240_v58, %v244_v59 }
  0x27   :  { %1769 = vmatpush1.bf16.msra.mxu0 %v2851_v39  ;;  %v252_v3 = vld [vmem:[#allocation2 + $0x220] sm:$0xff]  ;;  %v257_v14 = vld [vmem:[#allocation2 + $0x248] sm:$0xff]  ;;  %v2894_v16 = vcombine.high %v249_v6, %v253_v7  ;;  %v2893_v21 = vcombine.low %v249_v6, %v253_v7 }
  0x28   :  { %1770 = vmatprep.subr.bf16.mxu0 %v2860_v42  ;;  %1851 = vmatpush1.bf16.msra.mxu1 %v2853_v43  ;;  %v256_v10 = vld [vmem:[#allocation2 + $0x240] sm:$0xff]  ;;  %v2892_v12 = vcombine.high %v248_v2, %v252_v3  ;;  %v261_v15 = vld [vmem:[#allocation2 + $0x268] sm:$0xff]  ;;  %v2891_v17 = vcombine.low %v248_v2, %v252_v3 }
  0x29   :  { %1852 = vmatprep.subr.bf16.mxu1 %v2862_v46  ;;  %v260_v11 = vld [vmem:[#allocation2 + $0x260] sm:$0xff]  ;;  %v265_v22 = vld [vmem:[#allocation2 + $0x288] sm:$0xff]  ;;  %v2902_v24 = vcombine.high %v257_v14, %v261_v15  ;;  %v2901_v29 = vcombine.low %v257_v14, %v261_v15  ;;  %v50_v15 = vlaneseq }
  0x2a   :  { %v264_v18 = vld [vmem:[#allocation2 + $0x280] sm:$0xff]  ;;  %v2900_v20 = vcombine.high %v256_v10, %v260_v11  ;;  %v269_v23 = vld [vmem:[#allocation2 + $0x2a8] sm:$0xff]  ;;  %v2899_v25 = vcombine.low %v256_v10, %v260_v11 }
  0x2b   :  { %1771 = vmatpush1.bf16.msra.mxu0 %v2859_v47  ;;  %v268_v19 = vld [vmem:[#allocation2 + $0x2a0] sm:$0xff]  ;;  %v273_v30 = vld [vmem:[#allocation2 + $0x2c8] sm:$0xff]  ;;  %v2910_v32 = vcombine.high %v265_v22, %v269_v23  ;;  %v2909_v37 = vcombine.low %v265_v22, %v269_v23 }
  0x2c   :  { %1772 = vmatprep.subr.bf16.mxu0 %v2868_v50  ;;  %1853 = vmatpush1.bf16.msra.mxu1 %v2861_v52  ;;  %v272_v26 = vld [vmem:[#allocation2 + $0x2c0] sm:$0xff]  ;;  %v2908_v28 = vcombine.high %v264_v18, %v268_v19  ;;  %v277_v31 = vld [vmem:[#allocation2 + $0x2e8] sm:$0xff]  ;;  %v2907_v33 = vcombine.low %v264_v18, %v268_v19 }
  0x2d   :  { %1854 = vmatprep.subr.bf16.mxu1 %v2870_v56  ;;  %v276_v27 = vld [vmem:[#allocation2 + $0x2e0] sm:$0xff]  ;;  %v281_v38 = vld [vmem:[#allocation2 + $0x308] sm:$0xff]  ;;  %v2918_v40 = vcombine.high %v273_v30, %v277_v31  ;;  %v2917_v45 = vcombine.low %v273_v30, %v277_v31 }
  0x2e   :  { %v280_v34 = vld [vmem:[#allocation2 + $0x300] sm:$0xff]  ;;  %v2916_v36 = vcombine.high %v272_v26, %v276_v27  ;;  %v285_v39 = vld [vmem:[#allocation2 + $0x328] sm:$0xff]  ;;  %v2915_v41 = vcombine.low %v272_v26, %v276_v27 }
  0x2f   :  { %1773 = vmatpush1.bf16.msra.mxu0 %v2867_v57  ;;  %v284_v35 = vld [vmem:[#allocation2 + $0x320] sm:$0xff]  ;;  %v289_v46 = vld [vmem:[#allocation2 + $0x348] sm:$0xff]  ;;  %v2926_v48 = vcombine.high %v281_v38, %v285_v39  ;;  %v2925_v51 = vcombine.low %v281_v38, %v285_v39 }
  0x30   :  { %1774 = vmatprep.subr.bf16.mxu0 %v2876_v60  ;;  %1855 = vmatpush1.bf16.msra.mxu1 %v2869_v61  ;;  %v288_v42 = vld [vmem:[#allocation2 + $0x340] sm:$0xff]  ;;  %v2924_v44 = vcombine.high %v280_v34, %v284_v35  ;;  %v293_v47 = vld [vmem:[#allocation2 + $0x368] sm:$0xff]  ;;  %v2923_v49 = vcombine.low %v280_v34, %v284_v35 }
  0x31   :  { %1856 = vmatprep.subr.bf16.mxu1 %v2878_v0  ;;  %v292_v43 = vld [vmem:[#allocation2 + $0x360] sm:$0xff]  ;;  %v2934_v52 = vcombine.high %v289_v46, %v293_v47  ;;  %v2933_v54 = vcombine.low %v289_v46, %v293_v47  ;;  %v297_v57 = vld [vmem:[#allocation2 + $0x388] sm:$0xff] }
  0x32   :  { %v2932_v50 = vcombine.high %v288_v42, %v292_v43  ;;  %v2931_v53 = vcombine.low %v288_v42, %v292_v43  ;;  %v296_v55 = vld [vmem:[#allocation2 + $0x380] sm:$0xff]  ;;  %v301_v59 = vld [vmem:[#allocation2 + $0x3a8] sm:$0xff] }
  0x33   :  { %1775 = vmatpush1.bf16.msra.mxu0 %v2875_v1  ;;  %v300_v56 = vld [vmem:[#allocation2 + $0x3a0] sm:$0xff]  ;;  %v2941_v61 = vcombine.low %v297_v57, %v301_v59  ;;  %v2942_v62 = vcombine.high %v297_v57, %v301_v59  ;;  %v305_v1 = vld [vmem:[#allocation2 + $0x3c8] sm:$0xff] }
  0x34   :  { %1776 = vmatprep.subr.bf16.mxu0 %v2884_v4  ;;  %1857 = vmatpush1.bf16.msra.mxu1 %v2877_v5  ;;  %v2940_v58 = vcombine.high %v296_v55, %v300_v56  ;;  %v2939_v60 = vcombine.low %v296_v55, %v300_v56  ;;  %v304_v63 = vld [vmem:[#allocation2 + $0x3c0] sm:$0xff]  ;;  %v309_v3 = vld [vmem:[#allocation2 + $0x3e8] sm:$0xff] }
  0x35   :  { %1858 = vmatprep.subr.bf16.mxu1 %v2886_v8  ;;  %v308_v0 = vld [vmem:[#allocation2 + $0x3e0] sm:$0xff]  ;;  %v2949_v5 = vcombine.low %v305_v1, %v309_v3  ;;  %v2950_v6 = vcombine.high %v305_v1, %v309_v3  ;;  %v317_v11 = vld [vmem:[#allocation2 + $0x428] sm:$0xff] }
  0x36   :  { %v2948_v2 = vcombine.high %v304_v63, %v308_v0  ;;  %v2947_v4 = vcombine.low %v304_v63, %v308_v0  ;;  %v312_v7 = vld [vmem:[#allocation2 + $0x400] sm:$0xff]  ;;  %v337_v57 = vld [vmem:[#allocation2 + $0x4c8] sm:$0xff] }
  0x37   :  { %1777 = vmatpush1.bf16.msra.mxu0 %v2883_v9  ;;  %v316_v8 = vld [vmem:[#allocation2 + $0x420] sm:$0xff]  ;;  %v313_v9 = vld [vmem:[#allocation2 + $0x408] sm:$0xff] }
  0x38   :  { %1778 = vmatprep.subr.bf16.mxu0 %v2892_v12  ;;  %1859 = vmatpush1.bf16.msra.mxu1 %v2885_v13  ;;  %v2956_v10 = vcombine.high %v312_v7, %v316_v8  ;;  %v2955_v12 = vcombine.low %v312_v7, %v316_v8  ;;  %v2957_v13 = vcombine.low %v313_v9, %v317_v11  ;;  %v3467_v18 = vld [vmem:[%s3745_s2] sm:$0xf]  ;;  %v345_v1 = vld [vmem:[#allocation2 + $0x508] sm:$0xff] }
  0x39   :  { %1860 = vmatprep.subr.bf16.mxu1 %v2894_v16  ;;  %v2958_v14 = vcombine.high %v313_v9, %v317_v11  ;;  %v3461_v16 = vshrl.u32 %v50_v15, 7  ;;  %v324_v35 = vld [vmem:[#allocation2 + $0x460] sm:$0xff]  ;;  %v353_v9 = vld [vmem:[#allocation2 + $0x548] sm:$0xff] }
  0x3a   :  { %v328_v46 = vld [vmem:[#allocation2 + $0x480] sm:$0xff] }
  0x3b   :  { %1779 = vmatpush1.bf16.msra.mxu0 %v2891_v17  ;;  %v52_v17 = vsub.s32 0, %v3461_v16  ;;  %v56_v19 = vsub.s32 1, %v3461_v16  ;;  %v332_v47 = vld [vmem:[#allocation2 + $0x4a0] sm:$0xff] }
  0x3c   :  { %1780 = vmatprep.subr.bf16.mxu0 %v2900_v20  ;;  %1861 = vmatpush1.bf16.msra.mxu1 %v2893_v21  ;;  %v64_v20 = vsub.s32 3, %v3461_v16  ;;  %v336_v55 = vld [vmem:[#allocation2 + $0x4c0] sm:$0xff]  ;;  %v2971_v59 = vcombine.low %v328_v46, %v332_v47 }
  0x3d   :  { %1862 = vmatprep.subr.bf16.mxu1 %v2902_v24  ;;  %v53_v21 = vrot.slane %v3467_v18, %v52_v17  ;;  %v57_v22 = vrot.slane %v3467_v18, %v56_v19  ;;  %v340_v56 = vld [vmem:[#allocation2 + $0x4e0] sm:$0xff] }
  0x3e   :  { %v65_v24 = vrot.slane %v3467_v18, %v64_v20  ;;  %v344_v63 = vld [vmem:[#allocation2 + $0x500] sm:$0xff]  ;;  %v2979_v3 = vcombine.low %v336_v55, %v340_v56 }
  0x3f   :  { %1781 = vmatpush1.bf16.msra.mxu0 %v2899_v25  ;;  %v348_v0 = vld [vmem:[#allocation2 + $0x520] sm:$0xff] }
  0x40   :  { %1782 = vmatprep.subr.bf16.mxu0 %v2908_v28  ;;  %1863 = vmatpush1.bf16.msra.mxu1 %v2901_v29  ;;  %v352_v7 = vld [vmem:[#allocation2 + $0x540] sm:$0xff]  ;;  %v2987_v11 = vcombine.low %v344_v63, %v348_v0 }
  0x41   :  { %1864 = vmatprep.subr.bf16.mxu1 %v2910_v32  ;;  %v320_v32 = vld [vmem:[#allocation2 + $0x440] sm:$0xff] }
  0x42   :  { %v356_v8 = vld [vmem:[#allocation2 + $0x560] sm:$0xff] }
  0x43   :  { %1783 = vmatpush1.bf16.msra.mxu0 %v2907_v33  ;;  %v360_v15 = vld [vmem:[#allocation2 + $0x580] sm:$0xff] }
  0x44   :  { %1784 = vmatprep.subr.bf16.mxu0 %v2916_v36  ;;  %1865 = vmatpush1.bf16.msra.mxu1 %v2909_v37  ;;  %v321_v36 = vld [vmem:[#allocation2 + $0x448] sm:$0xff] }
  0x45   :  { %1866 = vmatprep.subr.bf16.mxu1 %v2918_v40  ;;  %v325_v37 = vld [vmem:[#allocation2 + $0x468] sm:$0xff] }
  0x47   :  { %1785 = vmatpush1.bf16.msra.mxu0 %v2915_v41 }
  0x48   :  { %1786 = vmatprep.subr.bf16.mxu0 %v2924_v44  ;;  %1867 = vmatpush1.bf16.msra.mxu1 %v2917_v45  ;;  %v2964_v44 = vcombine.high %v320_v32, %v324_v35  ;;  %v2966_v45 = vcombine.high %v321_v36, %v325_v37 }
  0x49   :  { %1868 = vmatprep.subr.bf16.mxu1 %v2926_v48  ;;  %v329_v48 = vld [vmem:[#allocation2 + $0x488] sm:$0xff] }
  0x4b   :  { %1787 = vmatpush1.bf16.msra.mxu0 %v2923_v49  ;;  %v333_v49 = vld [vmem:[#allocation2 + $0x4a8] sm:$0xff] }
  0x4c   :  { %1788 = vmatprep.subr.bf16.mxu0 %v2932_v50  ;;  %1869 = vmatpush1.bf16.msra.mxu1 %v2925_v51  ;;  %v2963_v51 = vcombine.low %v320_v32, %v324_v35  ;;  %v373_v32 = vld [vmem:[#allocation2 + $0x5e8] sm:$0xff] }
  0x4d   :  { %1870 = vmatprep.subr.bf16.mxu1 %v2934_v52  ;;  %v2965_v52 = vcombine.low %v321_v36, %v325_v37  ;;  %v376_v37 = vld [vmem:[#allocation2 + $0x600] sm:$0xff] }
  0x4f   :  { %1789 = vmatpush1.bf16.msra.mxu0 %v2931_v53  ;;  %v2972_v53 = vcombine.high %v328_v46, %v332_v47  ;;  %v384_v47 = vld [vmem:[#allocation2 + $0x640] sm:$0xff] }
  0x50   :  { %1871 = vmatpush1.bf16.msra.mxu1 %v2933_v54  ;;  %1790 = vmatprep.subr.bf16.mxu0 %v2940_v58  ;;  %v2974_v54 = vcombine.high %v329_v48, %v333_v49  ;;  %v341_v58 = vld [vmem:[#allocation2 + $0x4e8] sm:$0xff] }
  0x51   :  { %1872 = vmatprep.subr.bf16.mxu1 %v2942_v62  ;;  %v2982_v62 = vcombine.high %v337_v57, %v341_v58 }
  0x53   :  { %1791 = vmatpush1.bf16.msra.mxu0 %v2939_v60  ;;  %v2973_v60 = vcombine.low %v329_v48, %v333_v49  ;;  %v388_v48 = vld [vmem:[#allocation2 + $0x660] sm:$0xff]  ;;  %v385_v49 = vld [vmem:[#allocation2 + $0x648] sm:$0xff] }
  0x54   :  { %1873 = vmatpush1.bf16.msra.mxu1 %v2941_v61  ;;  %1792 = vmatprep.subr.bf16.mxu0 %v2948_v2  ;;  %v2980_v61 = vcombine.high %v336_v55, %v340_v56  ;;  %v349_v2 = vld [vmem:[#allocation2 + $0x528] sm:$0xff]  ;;  %v392_v56 = vld [vmem:[#allocation2 + $0x680] sm:$0xff] }
  0x55   :  { %1874 = vmatprep.subr.bf16.mxu1 %v2950_v6  ;;  %v2990_v6 = vcombine.high %v345_v1, %v349_v2 }
  0x57   :  { %1793 = vmatpush1.bf16.msra.mxu0 %v2947_v4  ;;  %v2981_v4 = vcombine.low %v337_v57, %v341_v58  ;;  %v396_v57 = vld [vmem:[#allocation2 + $0x6a0] sm:$0xff]  ;;  %v393_v58 = vld [vmem:[#allocation2 + $0x688] sm:$0xff] }
  0x58   :  { %1875 = vmatpush1.bf16.msra.mxu1 %v2949_v5  ;;  %1803 = vmatprep.subr.bf16.mxu0 %v2956_v10  ;;  %v2988_v5 = vcombine.high %v344_v63, %v348_v0  ;;  %v357_v10 = vld [vmem:[#allocation2 + $0x568] sm:$0xff]  ;;  %v400_v0 = vld [vmem:[#allocation2 + $0x6c0] sm:$0xff] }
  0x59   :  { %1885 = vmatprep.subr.bf16.mxu1 %v2958_v14  ;;  %v2998_v14 = vcombine.high %v353_v9, %v357_v10 }
  0xed   :  { %v128_v23 = vpop.f32.mrb[0].mxu0 }
  0xee   :  { %v129_v25 = vadd.f32 %v128_v23, %v53_v21  ;;  %v130_v26 = vpop.f32.mrb[1].mxu0  ;;  %v3480_v29 = vpop.f32.mrb[0].mxu1  ;;  %v364_v21 = vld [vmem:[#allocation2 + $0x5a0] sm:$0xff]  ;;  %v365_v23 = vld [vmem:[#allocation2 + $0x5a8] sm:$0xff] }
  0xef   :  { %v131_v27 = vadd.f32 %v130_v26, %v57_v22  ;;  %v132_v28 = vpop.f32.mrb[2].mxu0  ;;  %v171_v33 = vpop.f32.mrb[1].mxu1  ;;  %v361_v22 = vld [vmem:[#allocation2 + $0x588] sm:$0xff]  ;;  %v3004_v26 = vcombine.high %v360_v15, %v364_v21 }
  0xf0   :  { %v176_v30 = vmax.f32 %v129_v25, 0.0  ;;  %v133_v31 = vpop.f32.mrb[3].mxu0  ;;  %v172_v38 = vadd.f32 %v171_v33, %v65_v24  ;;  %v173_v39 = vpop.f32.mrb[2].mxu1  ;;  %v2995_v24 = vcombine.low %v352_v7, %v356_v8  ;;  %v2997_v25 = vcombine.low %v353_v9, %v357_v10  ;;  %v368_v28 = vld [vmem:[#allocation2 + $0x5c0] sm:$0xff]  ;;  %v409_v10 = vld [vmem:[#allocation2 + $0x708] sm:$0xff] }
  0xf1   :  { %v177_v34 = vmax.f32 %v131_v27, 0.0  ;;  %v174_v40 = vpop.f32.mrb[3].mxu1  ;;  %v3006_v27 = vcombine.high %v361_v22, %v365_v23  ;;  %v369_v31 = vld [vmem:[#allocation2 + $0x5c8] sm:$0xff]  ;;  %v3003_v33 = vcombine.low %v360_v15, %v364_v21  ;;  %v412_v9 = vld [vmem:[#allocation2 + $0x720] sm:$0xff] }
  0xf2   :  { %v179_v42 = vmax.f32 %v172_v38, 0.0  ;;  %v3484_v43 = vpack.c.bf16 %v176_v30, %v176_v30  ;;  %v372_v30 = vld [vmem:[#allocation2 + $0x5e0] sm:$0xff]  ;;  %v3014_v36 = vcombine.high %v369_v31, %v373_v32  ;;  %v377_v39 = vld [vmem:[#allocation2 + $0x608] sm:$0xff] }
  0xf3   :  { %v3482_v41 = vpack.c.bf16 %v177_v34, %v177_v34  ;;  %v3005_v34 = vcombine.low %v361_v22, %v365_v23  ;;  %v3012_v35 = vcombine.high %v368_v28, %v372_v30  ;;  %v380_v38 = vld [vmem:[#allocation2 + $0x620] sm:$0xff]  ;;  %v381_v40 = vld [vmem:[#allocation2 + $0x628] sm:$0xff] }
  0xf4   :  { %v3488_v50 = vpack.c.bf16 %v179_v42, %v179_v42  ;;  %v3011_v42 = vcombine.low %v368_v28, %v372_v30  ;;  %v3022_v46 = vcombine.high %v377_v39, %v381_v40  ;;  %v416_v21 = vld [vmem:[#allocation2 + $0x740] sm:$0xff]  ;;  %v417_v23 = vld [vmem:[#allocation2 + $0x748] sm:$0xff] }
  0xf5   :  { %1794 = vmatprep.mubr.bf16.mxu0 %v3482_v41  ;;  %1876 = vmatprep.mubr.bf16.mxu1 %v3482_v41  ;;  %v420_v22 = vld [vmem:[#allocation2 + $0x760] sm:$0xff] }
  0xf6   :  { %1795 = vmatmul.mubr.bf16.vlgmr.msra.gmra.mrb[4].mxu0 %v3484_v43  ;;  %1877 = vmatmul.mubr.bf16.vlgmr.msra.gmra.mrb[4].mxu1 %v3484_v43  ;;  %v3060_v28 = vcombine.high %v416_v21, %v420_v22 }
  0xf7   :  { %1804 = vmatpush1.bf16.msra.mxu0 %v2955_v12  ;;  %1886 = vmatpush1.bf16.msra.mxu1 %v2957_v13  ;;  %v2989_v12 = vcombine.low %v345_v1, %v349_v2  ;;  %v2996_v13 = vcombine.high %v352_v7, %v356_v8  ;;  %v404_v1 = vld [vmem:[#allocation2 + $0x6e0] sm:$0xff]  ;;  %v401_v2 = vld [vmem:[#allocation2 + $0x6c8] sm:$0xff] }
  0xf8   :  { %1805 = vmatprep.subr.bf16.mxu0 %v2964_v44  ;;  %1887 = vmatprep.subr.bf16.mxu1 %v2966_v45  ;;  %v3013_v44 = vcombine.low %v369_v31, %v373_v32  ;;  %v3020_v45 = vcombine.high %v376_v37, %v380_v38  ;;  %v408_v8 = vld [vmem:[#allocation2 + $0x700] sm:$0xff] }
  0xf9   :  { %1835 = vmatprep.mubr.bf16.mxu0 %v3488_v50  ;;  %1917 = vmatprep.mubr.bf16.mxu1 %v3488_v50  ;;  %v424_v31 = vld [vmem:[#allocation2 + $0x780] sm:$0xff] }
  0xfa   :  { %v428_v32 = vld [vmem:[#allocation2 + $0x7a0] sm:$0xff] }
  0xfb   :  { %1806 = vmatpush1.bf16.msra.mxu0 %v2963_v51  ;;  %1888 = vmatpush1.bf16.msra.mxu1 %v2965_v52  ;;  %v389_v51 = vld [vmem:[#allocation2 + $0x668] sm:$0xff]  ;;  %v3019_v52 = vcombine.low %v376_v37, %v380_v38  ;;  %v3068_v38 = vcombine.high %v424_v31, %v428_v32 }
  0xfc   :  { %1807 = vmatprep.subr.bf16.mxu0 %v2972_v53  ;;  %1889 = vmatprep.subr.bf16.mxu1 %v2974_v54  ;;  %v3021_v53 = vcombine.low %v377_v39, %v381_v40  ;;  %v3028_v54 = vcombine.high %v384_v47, %v388_v48  ;;  %v3030_v55 = vcombine.high %v385_v49, %v389_v51  ;;  %v432_v40 = vld [vmem:[#allocation2 + $0x7c0] sm:$0xff] }
  0xff   :  { %1808 = vmatpush1.bf16.msra.mxu0 %v2971_v59  ;;  %1890 = vmatpush1.bf16.msra.mxu1 %v2973_v60  ;;  %v397_v59 = vld [vmem:[#allocation2 + $0x6a8] sm:$0xff]  ;;  %v3027_v60 = vcombine.low %v384_v47, %v388_v48  ;;  %v3067_v47 = vcombine.low %v424_v31, %v428_v32 }
 0x100   :  { %1809 = vmatprep.subr.bf16.mxu0 %v2980_v61  ;;  %1891 = vmatprep.subr.bf16.mxu1 %v2982_v62  ;;  %v3029_v61 = vcombine.low %v385_v49, %v389_v51  ;;  %v3036_v62 = vcombine.high %v392_v56, %v396_v57  ;;  %v3038_v63 = vcombine.high %v393_v58, %v397_v59  ;;  %v186_v51 = vld [vmem:[#allocation2 + $0x10] sm:$0xff] }
 0x103   :  { %1810 = vmatpush1.bf16.msra.mxu0 %v2979_v3  ;;  %1892 = vmatpush1.bf16.msra.mxu1 %v2981_v4  ;;  %v405_v3 = vld [vmem:[#allocation2 + $0x6e8] sm:$0xff]  ;;  %v3035_v4 = vcombine.low %v392_v56, %v396_v57 }
 0x104   :  { %1811 = vmatprep.subr.bf16.mxu0 %v2988_v5  ;;  %1893 = vmatprep.subr.bf16.mxu1 %v2990_v6  ;;  %v3037_v5 = vcombine.low %v393_v58, %v397_v59  ;;  %v3044_v6 = vcombine.high %v400_v0, %v404_v1  ;;  %v3046_v7 = vcombine.high %v401_v2, %v405_v3  ;;  %v194_v59 = vld [vmem:[#allocation2 + $0x50] sm:$0xff] }
 0x107   :  { %1812 = vmatpush1.bf16.msra.mxu0 %v2987_v11  ;;  %1894 = vmatpush1.bf16.msra.mxu1 %v2989_v12  ;;  %v413_v11 = vld [vmem:[#allocation2 + $0x728] sm:$0xff]  ;;  %v3043_v12 = vcombine.low %v400_v0, %v404_v1 }
 0x108   :  { %1813 = vmatprep.subr.bf16.mxu0 %v2996_v13  ;;  %1895 = vmatprep.subr.bf16.mxu1 %v2998_v14  ;;  %v3045_v13 = vcombine.low %v401_v2, %v405_v3  ;;  %v3052_v14 = vcombine.high %v408_v8, %v412_v9  ;;  %v3054_v15 = vcombine.high %v409_v10, %v413_v11 }
 0x10b   :  { %1814 = vmatpush1.bf16.msra.mxu0 %v2995_v24  ;;  %1896 = vmatpush1.bf16.msra.mxu1 %v2997_v25  ;;  %v421_v24 = vld [vmem:[#allocation2 + $0x768] sm:$0xff]  ;;  %v60_v25 = vsub.s32 2, %v3461_v16 }
 0x10c   :  { %1815 = vmatprep.subr.bf16.mxu0 %v3004_v26  ;;  %1897 = vmatprep.subr.bf16.mxu1 %v3006_v27  ;;  %v3051_v26 = vcombine.low %v408_v8, %v412_v9  ;;  %v3053_v27 = vcombine.low %v409_v10, %v413_v11  ;;  %v3062_v30 = vcombine.high %v417_v23, %v421_v24 }
 0x10d   :  { %v3061_v37 = vcombine.low %v417_v23, %v421_v24 }
 0x10f   :  { %1816 = vmatpush1.bf16.msra.mxu0 %v3003_v33  ;;  %1898 = vmatpush1.bf16.msra.mxu1 %v3005_v34  ;;  %v425_v33 = vld [vmem:[#allocation2 + $0x788] sm:$0xff] }
 0x110   :  { %1817 = vmatprep.subr.bf16.mxu0 %v3012_v35  ;;  %1899 = vmatprep.subr.bf16.mxu1 %v3014_v36  ;;  %v429_v34 = vld [vmem:[#allocation2 + $0x7a8] sm:$0xff]  ;;  %v61_v35 = vrot.slane %v3467_v18, %v60_v25  ;;  %v3059_v36 = vcombine.low %v416_v21, %v420_v22 }
 0x111   :  { %v3070_v39 = vcombine.high %v425_v33, %v429_v34  ;;  %v3069_v48 = vcombine.low %v425_v33, %v429_v34  ;;  %v226_v34 = vld [vmem:[#allocation2 + $0x150] sm:$0xff] }
 0x113   :  { %1818 = vmatpush1.bf16.msra.mxu0 %v3011_v42  ;;  %1900 = vmatpush1.bf16.msra.mxu1 %v3013_v44  ;;  %v436_v42 = vld [vmem:[#allocation2 + $0x7e0] sm:$0xff]  ;;  %v433_v44 = vld [vmem:[#allocation2 + $0x7c8] sm:$0xff] }
 0x114   :  { %1819 = vmatprep.subr.bf16.mxu0 %v3020_v45  ;;  %1901 = vmatprep.subr.bf16.mxu1 %v3022_v46  ;;  %v437_v45 = vld [vmem:[#allocation2 + $0x7e8] sm:$0xff]  ;;  %v170_v46 = vadd.f32 %v3480_v29, %v61_v35  ;;  %v3076_v18 = vcombine.high %v432_v40, %v436_v42  ;;  %v3075_v56 = vcombine.low %v432_v40, %v436_v42  ;;  %v230_v35 = vld [vmem:[#allocation2 + $0x170] sm:$0xff] }
 0x115   :  { %v3078_v49 = vcombine.high %v433_v44, %v437_v45  ;;  %v3077_v57 = vcombine.low %v433_v44, %v437_v45  ;;  %v2872_v40 = vcombine.high %v226_v34, %v230_v35  ;;  %v234_v44 = vld [vmem:[#allocation2 + $0x190] sm:$0xff] }
 0x116   :  { %v238_v45 = vld [vmem:[#allocation2 + $0x1b0] sm:$0xff] }
 0x117   :  { %1820 = vmatpush1.bf16.msra.mxu0 %v3019_v52  ;;  %1902 = vmatpush1.bf16.msra.mxu1 %v3021_v53  ;;  %v190_v52 = vld [vmem:[#allocation2 + $0x30] sm:$0xff]  ;;  %v187_v53 = vld [vmem:[#allocation2 + $0x18] sm:$0xff] }
 0x118   :  { %1821 = vmatprep.subr.bf16.mxu0 %v3028_v54  ;;  %1903 = vmatprep.subr.bf16.mxu1 %v3030_v55  ;;  %v191_v54 = vld [vmem:[#allocation2 + $0x38] sm:$0xff]  ;;  %v178_v55 = vmax.f32 %v170_v46, 0.0  ;;  %v2832_v29 = vcombine.high %v186_v51, %v190_v52  ;;  %v2831_v0 = vcombine.low %v186_v51, %v190_v52  ;;  %v242_v52 = vld [vmem:[#allocation2 + $0x1d0] sm:$0xff] }
 0x119   :  { %v2834_v58 = vcombine.high %v187_v53, %v191_v54  ;;  %v2833_v1 = vcombine.low %v187_v53, %v191_v54  ;;  %v235_v46 = vld [vmem:[#allocation2 + $0x198] sm:$0xff]  ;;  %v246_v53 = vld [vmem:[#allocation2 + $0x1f0] sm:$0xff] }
 0x11a   :  { %v243_v54 = vld [vmem:[#allocation2 + $0x1d8] sm:$0xff] }
 0x11b   :  { %1822 = vmatpush1.bf16.msra.mxu0 %v3027_v60  ;;  %1904 = vmatpush1.bf16.msra.mxu1 %v3029_v61  ;;  %v3499_v60 = vpack.c.bf16 %v178_v55, %v178_v55  ;;  %v198_v61 = vld [vmem:[#allocation2 + $0x70] sm:$0xff]  ;;  %v247_v55 = vld [vmem:[#allocation2 + $0x1f8] sm:$0xff] }
 0x11c   :  { %1823 = vmatprep.subr.bf16.mxu0 %v3036_v62  ;;  %1905 = vmatprep.subr.bf16.mxu1 %v3038_v63  ;;  %v195_v62 = vld [vmem:[#allocation2 + $0x58] sm:$0xff]  ;;  %v2840_v2 = vcombine.high %v194_v59, %v198_v61  ;;  %v2839_v8 = vcombine.low %v194_v59, %v198_v61  ;;  %v250_v59 = vld [vmem:[#allocation2 + $0x210] sm:$0xff] }
 0x11d   :  { %v199_v63 = vld [vmem:[#allocation2 + $0x78] sm:$0xff]  ;;  %v254_v61 = vld [vmem:[#allocation2 + $0x230] sm:$0xff] }
 0x11e   :  { %v2842_v3 = vcombine.high %v195_v62, %v199_v63  ;;  %v2841_v9 = vcombine.low %v195_v62, %v199_v63  ;;  %v251_v62 = vld [vmem:[#allocation2 + $0x218] sm:$0xff] }
 0x11f   :  { %1824 = vmatpush1.bf16.msra.mxu0 %v3035_v4  ;;  %1906 = vmatpush1.bf16.msra.mxu1 %v3037_v5  ;;  %v202_v4 = vld [vmem:[#allocation2 + $0x90] sm:$0xff]  ;;  %v255_v63 = vld [vmem:[#allocation2 + $0x238] sm:$0xff] }
 0x120   :  { %1825 = vmatprep.subr.bf16.mxu0 %v3044_v6  ;;  %1907 = vmatprep.subr.bf16.mxu1 %v3046_v7  ;;  %v206_v5 = vld [vmem:[#allocation2 + $0xb0] sm:$0xff]  ;;  %v203_v6 = vld [vmem:[#allocation2 + $0x98] sm:$0xff] }
 0x121   :  { %v207_v7 = vld [vmem:[#allocation2 + $0xb8] sm:$0xff]  ;;  %v2848_v10 = vcombine.high %v202_v4, %v206_v5  ;;  %v2847_v21 = vcombine.low %v202_v4, %v206_v5  ;;  %v258_v4 = vld [vmem:[#allocation2 + $0x250] sm:$0xff] }
 0x122   :  { %v2850_v11 = vcombine.high %v203_v6, %v207_v7  ;;  %v2849_v22 = vcombine.low %v203_v6, %v207_v7  ;;  %v262_v5 = vld [vmem:[#allocation2 + $0x270] sm:$0xff]  ;;  %v259_v6 = vld [vmem:[#allocation2 + $0x258] sm:$0xff] }
 0x123   :  { %1826 = vmatpush1.bf16.msra.mxu0 %v3043_v12  ;;  %1908 = vmatpush1.bf16.msra.mxu1 %v3045_v13  ;;  %v210_v12 = vld [vmem:[#allocation2 + $0xd0] sm:$0xff]  ;;  %v263_v7 = vld [vmem:[#allocation2 + $0x278] sm:$0xff] }
 0x124   :  { %1827 = vmatprep.subr.bf16.mxu0 %v3052_v14  ;;  %1909 = vmatprep.subr.bf16.mxu1 %v3054_v15  ;;  %v214_v13 = vld [vmem:[#allocation2 + $0xf0] sm:$0xff]  ;;  %v211_v14 = vld [vmem:[#allocation2 + $0xd8] sm:$0xff] }
 0x125   :  { %v215_v15 = vld [vmem:[#allocation2 + $0xf8] sm:$0xff]  ;;  %v2856_v23 = vcombine.high %v210_v12, %v214_v13 }
 0x126   :  { %v2858_v24 = vcombine.high %v211_v14, %v215_v15  ;;  %v2857_v31 = vcombine.low %v211_v14, %v215_v15  ;;  %v267_v14 = vld [vmem:[#allocation2 + $0x298] sm:$0xff] }
 0x127   :  { %1828 = vmatpush1.bf16.msra.mxu0 %v3051_v26  ;;  %1910 = vmatpush1.bf16.msra.mxu1 %v3053_v27  ;;  %v218_v26 = vld [vmem:[#allocation2 + $0x110] sm:$0xff]  ;;  %v271_v15 = vld [vmem:[#allocation2 + $0x2b8] sm:$0xff] }
 0x128   :  { %1829 = vmatprep.subr.bf16.mxu0 %v3060_v28  ;;  %1911 = vmatprep.subr.bf16.mxu1 %v3062_v30  ;;  %v222_v27 = vld [vmem:[#allocation2 + $0x130] sm:$0xff]  ;;  %v223_v28 = vld [vmem:[#allocation2 + $0x138] sm:$0xff]  ;;  %v2855_v30 = vcombine.low %v210_v12, %v214_v13 }
 0x129   :  { %v2864_v32 = vcombine.high %v218_v26, %v222_v27  ;;  %v266_v12 = vld [vmem:[#allocation2 + $0x290] sm:$0xff] }
 0x12a   :  { %v270_v13 = vld [vmem:[#allocation2 + $0x2b0] sm:$0xff] }
 0x12b   :  { %1830 = vmatpush1.bf16.msra.mxu0 %v3059_v36  ;;  %1912 = vmatpush1.bf16.msra.mxu1 %v3061_v37  ;;  %v227_v36 = vld [vmem:[#allocation2 + $0x158] sm:$0xff] }
 0x12c   :  { %1831 = vmatprep.subr.bf16.mxu0 %v3068_v38  ;;  %1913 = vmatprep.subr.bf16.mxu1 %v3070_v39  ;;  %v231_v37 = vld [vmem:[#allocation2 + $0x178] sm:$0xff]  ;;  %v2863_v38 = vcombine.low %v218_v26, %v222_v27  ;;  %v274_v26 = vld [vmem:[#allocation2 + $0x2d0] sm:$0xff] }
 0x12d   :  { %v2874_v42 = vcombine.high %v227_v36, %v231_v37  ;;  %v278_v27 = vld [vmem:[#allocation2 + $0x2f0] sm:$0xff] }
 0x12f   :  { %1832 = vmatpush1.bf16.msra.mxu0 %v3067_v47  ;;  %1914 = vmatpush1.bf16.msra.mxu1 %v3069_v48  ;;  %v239_v47 = vld [vmem:[#allocation2 + $0x1b8] sm:$0xff]  ;;  %v2871_v48 = vcombine.low %v226_v34, %v230_v35  ;;  %v282_v34 = vld [vmem:[#allocation2 + $0x310] sm:$0xff] }
 0x130   :  { %1833 = vmatprep.subr.bf16.mxu0 %v3076_v18  ;;  %1915 = vmatprep.subr.bf16.mxu1 %v3078_v49  ;;  %v2873_v18 = vcombine.low %v227_v36, %v231_v37  ;;  %v2880_v49 = vcombine.high %v234_v44, %v238_v45  ;;  %v2882_v51 = vcombine.high %v235_v46, %v239_v47  ;;  %v286_v35 = vld [vmem:[#allocation2 + $0x330] sm:$0xff]  ;;  %v283_v36 = vld [vmem:[#allocation2 + $0x318] sm:$0xff] }
 0x131   :  { %v287_v37 = vld [vmem:[#allocation2 + $0x338] sm:$0xff] }
 0x133   :  { %1834 = vmatpush1.bf16.msra.mxu0 %v3075_v56  ;;  %1916 = vmatpush1.bf16.msra.mxu1 %v3077_v57  ;;  %v2879_v56 = vcombine.low %v234_v44, %v238_v45  ;;  %v2881_v57 = vcombine.low %v235_v46, %v239_v47  ;;  %v290_v44 = vld [vmem:[#allocation2 + $0x350] sm:$0xff]  ;;  %v291_v46 = vld [vmem:[#allocation2 + $0x358] sm:$0xff] }
 0x134   :  { %1926 = vmatprep.subr.bf16.mxu0 %v2832_v29  ;;  %2008 = vmatprep.subr.bf16.mxu1 %v2834_v58  ;;  %v2888_v29 = vcombine.high %v242_v52, %v246_v53  ;;  %v2890_v58 = vcombine.high %v243_v54, %v247_v55  ;;  %v294_v45 = vld [vmem:[#allocation2 + $0x370] sm:$0xff]  ;;  %v295_v47 = vld [vmem:[#allocation2 + $0x378] sm:$0xff] }
 0x136   :  { %1836 = vmatmul.mubr.bf16.vlgmr.msra.gmra.mrb[4].mxu0 %v3499_v60  ;;  %1918 = vmatmul.mubr.bf16.vlgmr.msra.gmra.mrb[4].mxu1 %v3499_v60 }
 0x137   :  { %1927 = vmatpush1.bf16.msra.mxu0 %v2831_v0  ;;  %1958 = vmatprep.mubr.bf16.mxu0 %v3482_v41  ;;  %v2887_v0 = vcombine.low %v242_v52, %v246_v53  ;;  %v298_v52 = vld [vmem:[#allocation2 + $0x390] sm:$0xff] }
 0x138   :  { %2009 = vmatpush1.bf16.msra.mxu1 %v2833_v1  ;;  %2040 = vmatprep.mubr.bf16.mxu1 %v3482_v41  ;;  %v219_v41 = vld [vmem:[#allocation2 + $0x118] sm:$0xff]  ;;  %v2889_v1 = vcombine.low %v243_v54, %v247_v55  ;;  %v302_v53 = vld [vmem:[#allocation2 + $0x3b0] sm:$0xff] }
 0x139   :  { %1928 = vmatprep.subr.bf16.mxu0 %v2840_v2  ;;  %2010 = vmatprep.subr.bf16.mxu1 %v2842_v3  ;;  %v2866_v33 = vcombine.high %v219_v41, %v223_v28  ;;  %v2865_v39 = vcombine.low %v219_v41, %v223_v28  ;;  %v2896_v2 = vcombine.high %v250_v59, %v254_v61  ;;  %v275_v41 = vld [vmem:[#allocation2 + $0x2d8] sm:$0xff] }
 0x13a   :  { %v2898_v3 = vcombine.high %v251_v62, %v255_v63  ;;  %v279_v28 = vld [vmem:[#allocation2 + $0x2f8] sm:$0xff] }
 0x13b   :  { %1929 = vmatpush1.bf16.msra.mxu0 %v2839_v8  ;;  %v2895_v8 = vcombine.low %v250_v59, %v254_v61  ;;  %v299_v54 = vld [vmem:[#allocation2 + $0x398] sm:$0xff]  ;;  %v306_v59 = vld [vmem:[#allocation2 + $0x3d0] sm:$0xff] }
 0x13c   :  { %2011 = vmatpush1.bf16.msra.mxu1 %v2841_v9  ;;  %1930 = vmatprep.subr.bf16.mxu0 %v2848_v10  ;;  %v2897_v9 = vcombine.low %v251_v62, %v255_v63  ;;  %v2904_v10 = vcombine.high %v258_v4, %v262_v5  ;;  %v303_v55 = vld [vmem:[#allocation2 + $0x3b8] sm:$0xff]  ;;  %v310_v61 = vld [vmem:[#allocation2 + $0x3f0] sm:$0xff] }
 0x13d   :  { %2012 = vmatprep.subr.bf16.mxu1 %v2850_v11  ;;  %v2906_v11 = vcombine.high %v259_v6, %v263_v7  ;;  %v307_v62 = vld [vmem:[#allocation2 + $0x3d8] sm:$0xff] }
 0x13e   :  { %v311_v63 = vld [vmem:[#allocation2 + $0x3f8] sm:$0xff] }
 0x13f   :  { %1931 = vmatpush1.bf16.msra.mxu0 %v2847_v21  ;;  %v2903_v21 = vcombine.low %v258_v4, %v262_v5  ;;  %v314_v4 = vld [vmem:[#allocation2 + $0x410] sm:$0xff] }
 0x140   :  { %2013 = vmatpush1.bf16.msra.mxu1 %v2849_v22  ;;  %1932 = vmatprep.subr.bf16.mxu0 %v2856_v23  ;;  %v2905_v22 = vcombine.low %v259_v6, %v263_v7  ;;  %v2912_v23 = vcombine.high %v266_v12, %v270_v13  ;;  %v318_v5 = vld [vmem:[#allocation2 + $0x430] sm:$0xff]  ;;  %v315_v6 = vld [vmem:[#allocation2 + $0x418] sm:$0xff] }
 0x141   :  { %2014 = vmatprep.subr.bf16.mxu1 %v2858_v24  ;;  %v2914_v24 = vcombine.high %v267_v14, %v271_v15  ;;  %v319_v7 = vld [vmem:[#allocation2 + $0x438] sm:$0xff] }
 0x143   :  { %1933 = vmatpush1.bf16.msra.mxu0 %v2855_v30  ;;  %v2911_v30 = vcombine.low %v266_v12, %v270_v13  ;;  %v322_v12 = vld [vmem:[#allocation2 + $0x450] sm:$0xff] }
 0x144   :  { %2015 = vmatpush1.bf16.msra.mxu1 %v2857_v31  ;;  %1934 = vmatprep.subr.bf16.mxu0 %v2864_v32  ;;  %v2913_v31 = vcombine.low %v267_v14, %v271_v15  ;;  %v2920_v32 = vcombine.high %v274_v26, %v278_v27  ;;  %v326_v13 = vld [vmem:[#allocation2 + $0x470] sm:$0xff]  ;;  %v2959_v14 = vcombine.low %v314_v4, %v318_v5  ;;  %v323_v15 = vld [vmem:[#allocation2 + $0x458] sm:$0xff] }
 0x145   :  { %2016 = vmatprep.subr.bf16.mxu1 %v2866_v33  ;;  %v2922_v33 = vcombine.high %v275_v41, %v279_v28 }
 0x147   :  { %1935 = vmatpush1.bf16.msra.mxu0 %v2863_v38  ;;  %v2919_v38 = vcombine.low %v274_v26, %v278_v27  ;;  %v334_v26 = vld [vmem:[#allocation2 + $0x4b0] sm:$0xff] }
 0x148   :  { %2017 = vmatpush1.bf16.msra.mxu1 %v2865_v39  ;;  %1936 = vmatprep.subr.bf16.mxu0 %v2872_v40  ;;  %v2921_v39 = vcombine.low %v275_v41, %v279_v28  ;;  %v2928_v40 = vcombine.high %v282_v34, %v286_v35  ;;  %v331_v41 = vld [vmem:[#allocation2 + $0x498] sm:$0xff] }
 0x149   :  { %2018 = vmatprep.subr.bf16.mxu1 %v2874_v42  ;;  %v2930_v42 = vcombine.high %v283_v36, %v287_v37  ;;  %v335_v28 = vld [vmem:[#allocation2 + $0x4b8] sm:$0xff] }
 0x14b   :  { %1937 = vmatpush1.bf16.msra.mxu0 %v2871_v48  ;;  %v2927_v48 = vcombine.low %v282_v34, %v286_v35  ;;  %v338_v34 = vld [vmem:[#allocation2 + $0x4d0] sm:$0xff] }
 0x14c   :  { %2019 = vmatpush1.bf16.msra.mxu1 %v2873_v18  ;;  %1938 = vmatprep.subr.bf16.mxu0 %v2880_v49  ;;  %v2929_v18 = vcombine.low %v283_v36, %v287_v37  ;;  %v2936_v49 = vcombine.high %v290_v44, %v294_v45  ;;  %v342_v35 = vld [vmem:[#allocation2 + $0x4f0] sm:$0xff]  ;;  %v339_v36 = vld [vmem:[#allocation2 + $0x4d8] sm:$0xff] }
 0x14d   :  { %2020 = vmatprep.subr.bf16.mxu1 %v2882_v51  ;;  %v2938_v51 = vcombine.high %v291_v46, %v295_v47  ;;  %v343_v37 = vld [vmem:[#allocation2 + $0x4f8] sm:$0xff] }
 0x14f   :  { %1939 = vmatpush1.bf16.msra.mxu0 %v2879_v56  ;;  %v2935_v56 = vcombine.low %v290_v44, %v294_v45  ;;  %v350_v44 = vld [vmem:[#allocation2 + $0x530] sm:$0xff]  ;;  %v347_v45 = vld [vmem:[#allocation2 + $0x518] sm:$0xff] }
 0x150   :  { %2021 = vmatpush1.bf16.msra.mxu1 %v2881_v57  ;;  %1940 = vmatprep.subr.bf16.mxu0 %v2888_v29  ;;  %v2937_v57 = vcombine.low %v291_v46, %v295_v47  ;;  %v2944_v29 = vcombine.high %v298_v52, %v302_v53  ;;  %v351_v46 = vld [vmem:[#allocation2 + $0x538] sm:$0xff]  ;;  %v2985_v47 = vcombine.low %v339_v36, %v343_v37 }
 0x151   :  { %2022 = vmatprep.subr.bf16.mxu1 %v2890_v58  ;;  %v2946_v58 = vcombine.high %v299_v54, %v303_v55 }
 0x153   :  { %1941 = vmatpush1.bf16.msra.mxu0 %v2887_v0  ;;  %v2943_v0 = vcombine.low %v298_v52, %v302_v53  ;;  %v355_v52 = vld [vmem:[#allocation2 + $0x558] sm:$0xff] }
 0x154   :  { %2023 = vmatpush1.bf16.msra.mxu1 %v2889_v1  ;;  %1942 = vmatprep.subr.bf16.mxu0 %v2896_v2  ;;  %v2945_v1 = vcombine.low %v299_v54, %v303_v55  ;;  %v2952_v2 = vcombine.high %v306_v59, %v310_v61  ;;  %v359_v53 = vld [vmem:[#allocation2 + $0x578] sm:$0xff]  ;;  %v2993_v55 = vcombine.low %v347_v45, %v351_v46 }
 0x155   :  { %2024 = vmatprep.subr.bf16.mxu1 %v2898_v3  ;;  %v2954_v3 = vcombine.high %v307_v62, %v311_v63 }
 0x157   :  { %1943 = vmatpush1.bf16.msra.mxu0 %v2895_v8  ;;  %v2951_v8 = vcombine.low %v306_v59, %v310_v61  ;;  %v363_v59 = vld [vmem:[#allocation2 + $0x598] sm:$0xff] }
 0x158   :  { %2025 = vmatpush1.bf16.msra.mxu1 %v2897_v9  ;;  %1944 = vmatprep.subr.bf16.mxu0 %v2904_v10  ;;  %v2953_v9 = vcombine.low %v307_v62, %v311_v63  ;;  %v2960_v10 = vcombine.high %v314_v4, %v318_v5  ;;  %v367_v61 = vld [vmem:[#allocation2 + $0x5b8] sm:$0xff]  ;;  %v3001_v63 = vcombine.low %v355_v52, %v359_v53 }
 0x159   :  { %2026 = vmatprep.subr.bf16.mxu1 %v2906_v11  ;;  %v2962_v11 = vcombine.high %v315_v6, %v319_v7  ;;  %v371_v4 = vld [vmem:[#allocation2 + $0x5d8] sm:$0xff] }
 0x15a   :  { %v375_v5 = vld [vmem:[#allocation2 + $0x5f8] sm:$0xff] }
 0x15b   :  { %1945 = vmatpush1.bf16.msra.mxu0 %v2903_v21  ;;  %v327_v21 = vld [vmem:[#allocation2 + $0x478] sm:$0xff] }
 0x15c   :  { %2027 = vmatpush1.bf16.msra.mxu1 %v2905_v22  ;;  %1946 = vmatprep.subr.bf16.mxu0 %v2912_v23  ;;  %v2961_v22 = vcombine.low %v315_v6, %v319_v7  ;;  %v2968_v23 = vcombine.high %v322_v12, %v326_v13  ;;  %v2970_v27 = vcombine.high %v323_v15, %v327_v21 }
 0x15d   :  { %2028 = vmatprep.subr.bf16.mxu1 %v2914_v24  ;;  %v330_v24 = vld [vmem:[#allocation2 + $0x490] sm:$0xff]  ;;  %v3009_v7 = vcombine.low %v363_v59, %v367_v61 }
 0x15f   :  { %1947 = vmatpush1.bf16.msra.mxu0 %v2911_v30  ;;  %v2967_v30 = vcombine.low %v322_v12, %v326_v13  ;;  %v379_v12 = vld [vmem:[#allocation2 + $0x618] sm:$0xff] }
 0x160   :  { %2029 = vmatpush1.bf16.msra.mxu1 %v2913_v31  ;;  %1948 = vmatprep.subr.bf16.mxu0 %v2920_v32  ;;  %v2969_v31 = vcombine.low %v323_v15, %v327_v21  ;;  %v2976_v32 = vcombine.high %v330_v24, %v334_v26  ;;  %v383_v13 = vld [vmem:[#allocation2 + $0x638] sm:$0xff]  ;;  %v3017_v15 = vcombine.low %v371_v4, %v375_v5 }
 0x161   :  { %2030 = vmatprep.subr.bf16.mxu1 %v2922_v33  ;;  %v2978_v33 = vcombine.high %v331_v41, %v335_v28 }
 0x163   :  { %1949 = vmatpush1.bf16.msra.mxu0 %v2919_v38  ;;  %v2975_v38 = vcombine.low %v330_v24, %v334_v26  ;;  %v390_v24 = vld [vmem:[#allocation2 + $0x670] sm:$0xff]  ;;  %v387_v26 = vld [vmem:[#allocation2 + $0x658] sm:$0xff] }
 0x164   :  { %2031 = vmatpush1.bf16.msra.mxu1 %v2921_v39  ;;  %1950 = vmatprep.subr.bf16.mxu0 %v2928_v40  ;;  %v2984_v39 = vcombine.high %v338_v34, %v342_v35  ;;  %v2986_v40 = vcombine.high %v339_v36, %v343_v37 }
 0x165   :  { %2032 = vmatprep.subr.bf16.mxu1 %v2930_v42  ;;  %v346_v42 = vld [vmem:[#allocation2 + $0x510] sm:$0xff] }
 0x166   :  { %v2991_v54 = vcombine.low %v346_v42, %v350_v44 }
 0x167   :  { %1951 = vmatpush1.bf16.msra.mxu0 %v2927_v48  ;;  %v2992_v48 = vcombine.high %v346_v42, %v350_v44  ;;  %v403_v42 = vld [vmem:[#allocation2 + $0x6d8] sm:$0xff] }
 0x168   :  { %2033 = vmatpush1.bf16.msra.mxu1 %v2929_v18  ;;  %1952 = vmatprep.subr.bf16.mxu0 %v2936_v49  ;;  %v2994_v18 = vcombine.high %v347_v45, %v351_v46  ;;  %v354_v49 = vld [vmem:[#allocation2 + $0x550] sm:$0xff]  ;;  %v407_v44 = vld [vmem:[#allocation2 + $0x6f8] sm:$0xff] }
 0x169   :  { %2034 = vmatprep.subr.bf16.mxu1 %v2938_v51  ;;  %v358_v51 = vld [vmem:[#allocation2 + $0x570] sm:$0xff] }
 0x16a   :  { %v2999_v62 = vcombine.low %v354_v49, %v358_v51 }
 0x16b   :  { %1953 = vmatpush1.bf16.msra.mxu0 %v2935_v56  ;;  %v3000_v56 = vcombine.high %v354_v49, %v358_v51  ;;  %v411_v49 = vld [vmem:[#allocation2 + $0x718] sm:$0xff] }
 0x16c   :  { %2035 = vmatpush1.bf16.msra.mxu1 %v2937_v57  ;;  %1954 = vmatprep.subr.bf16.mxu0 %v2944_v29  ;;  %v3002_v57 = vcombine.high %v355_v52, %v359_v53  ;;  %v362_v29 = vld [vmem:[#allocation2 + $0x590] sm:$0xff]  ;;  %v415_v51 = vld [vmem:[#allocation2 + $0x738] sm:$0xff]  ;;  %v3049_v53 = vcombine.low %v403_v42, %v407_v44 }
 0x16d   :  { %2036 = vmatprep.subr.bf16.mxu1 %v2946_v58  ;;  %v366_v58 = vld [vmem:[#allocation2 + $0x5b0] sm:$0xff] }
 0x16e   :  { %v3007_v6 = vcombine.low %v362_v29, %v366_v58 }
 0x16f   :  { %1955 = vmatpush1.bf16.msra.mxu0 %v2943_v0  ;;  %v3008_v0 = vcombine.high %v362_v29, %v366_v58  ;;  %v419_v29 = vld [vmem:[#allocation2 + $0x758] sm:$0xff] }
 0x170   :  { %2037 = vmatpush1.bf16.msra.mxu1 %v2945_v1  ;;  %1956 = vmatprep.subr.bf16.mxu0 %v2952_v2  ;;  %v3010_v1 = vcombine.high %v363_v59, %v367_v61  ;;  %v370_v2 = vld [vmem:[#allocation2 + $0x5d0] sm:$0xff]  ;;  %v423_v58 = vld [vmem:[#allocation2 + $0x778] sm:$0xff]  ;;  %v3057_v61 = vcombine.low %v411_v49, %v415_v51 }
 0x171   :  { %2038 = vmatprep.subr.bf16.mxu1 %v2954_v3  ;;  %v374_v3 = vld [vmem:[#allocation2 + $0x5f0] sm:$0xff] }
 0x173   :  { %1957 = vmatpush1.bf16.msra.mxu0 %v2951_v8  ;;  %v3016_v8 = vcombine.high %v370_v2, %v374_v3 }
 0x174   :  { %2039 = vmatpush1.bf16.msra.mxu1 %v2953_v9  ;;  %1967 = vmatprep.subr.bf16.mxu0 %v2960_v10  ;;  %v3018_v9 = vcombine.high %v371_v4, %v375_v5  ;;  %v378_v10 = vld [vmem:[#allocation2 + $0x610] sm:$0xff]  ;;  %v3065_v5 = vcombine.low %v419_v29, %v423_v58 }
 0x175   :  { %2049 = vmatprep.subr.bf16.mxu1 %v2962_v11  ;;  %v382_v11 = vld [vmem:[#allocation2 + $0x630] sm:$0xff] }
 0x176   :  { %1959 = vmatmul.mubr.bf16.vlgmr.msra.gmra.mrb[8].mxu0 %v3484_v43  ;;  %v3024_v21 = vcombine.high %v378_v10, %v382_v11 }
 0x177   :  { %2041 = vmatmul.mubr.bf16.vlgmr.msra.gmra.mrb[8].mxu1 %v3484_v43  ;;  %1968 = vmatpush1.bf16.msra.mxu0 %v2959_v14  ;;  %v2977_v43 = vcombine.low %v331_v41, %v335_v28  ;;  %v3015_v14 = vcombine.low %v370_v2, %v374_v3  ;;  %v3023_v41 = vcombine.low %v378_v10, %v382_v11  ;;  %v427_v2 = vld [vmem:[#allocation2 + $0x798] sm:$0xff] }
 0x178   :  { %1999 = vmatprep.mubr.bf16.mxu0 %v3488_v50  ;;  %2050 = vmatpush1.bf16.msra.mxu1 %v2961_v22  ;;  %v3026_v22 = vcombine.high %v379_v12, %v383_v13  ;;  %v3025_v28 = vcombine.low %v379_v12, %v383_v13  ;;  %v431_v3 = vld [vmem:[#allocation2 + $0x7b8] sm:$0xff] }
 0x179   :  { %2081 = vmatprep.mubr.bf16.mxu1 %v3488_v50  ;;  %1969 = vmatprep.subr.bf16.mxu0 %v2968_v23  ;;  %v2983_v50 = vcombine.low %v338_v34, %v342_v35  ;;  %v386_v23 = vld [vmem:[#allocation2 + $0x650] sm:$0xff]  ;;  %v395_v34 = vld [vmem:[#allocation2 + $0x698] sm:$0xff]  ;;  %v3073_v13 = vcombine.low %v427_v2, %v431_v3 }
 0x17a   :  { %2051 = vmatprep.subr.bf16.mxu1 %v2970_v27  ;;  %v391_v27 = vld [vmem:[#allocation2 + $0x678] sm:$0xff]  ;;  %v3031_v36 = vcombine.low %v386_v23, %v390_v24 }
 0x17b   :  { %1970 = vmatpush1.bf16.msra.mxu0 %v2967_v30  ;;  %v3032_v30 = vcombine.high %v386_v23, %v390_v24  ;;  %v399_v35 = vld [vmem:[#allocation2 + $0x6b8] sm:$0xff]  ;;  %v3033_v37 = vcombine.low %v387_v26, %v391_v27  ;;  %v3274_v23 = vld [vmem:[%s3748_s5 + $0x40] sm:$0xff]  }
 0x17c   :  { %2052 = vmatpush1.bf16.msra.mxu1 %v2969_v31  ;;  %1971 = vmatprep.subr.bf16.mxu0 %v2976_v32  ;;  %v3034_v31 = vcombine.high %v387_v26, %v391_v27  ;;  %v394_v32 = vld [vmem:[#allocation2 + $0x690] sm:$0xff]  ;;  %v3041_v46 = vcombine.low %v395_v34, %v399_v35  ;;  %v435_v10 = vld [vmem:[#allocation2 + $0x7d8] sm:$0xff]  ;;  %v3275_v24 = vld [vmem:[%s3748_s5 + $0xc0] sm:$0xff]  }
 0x17d   :  { %2053 = vmatprep.subr.bf16.mxu1 %v2978_v33  ;;  %v398_v33 = vld [vmem:[#allocation2 + $0x6b0] sm:$0xff]  ;;  %v439_v11 = vld [vmem:[#allocation2 + $0x7f8] sm:$0xff]  ;;  %v3276_v26 = vld [vmem:[%s3748_s5] sm:$0xff]  }
 0x17e   :  { %v3039_v45 = vcombine.low %v394_v32, %v398_v33  ;;  %v3277_v27 = vld [vmem:[%s3748_s5 + $0x80] sm:$0xff]  }
 0x17f   :  { %1972 = vmatpush1.bf16.msra.mxu0 %v2975_v38  ;;  %v3040_v38 = vcombine.high %v394_v32, %v398_v33  ;;  %v3282_v32 = vld [vmem:[%s3748_s5 + $0x50] sm:$0xff]  }
 0x180   :  { %2054 = vmatpush1.bf16.msra.mxu1 %v2977_v43  ;;  %1973 = vmatprep.subr.bf16.mxu0 %v2984_v39  ;;  %v3042_v43 = vcombine.high %v395_v34, %v399_v35  ;;  %v402_v39 = vld [vmem:[#allocation2 + $0x6d0] sm:$0xff]  ;;  %v3286_v35 = vld [vmem:[%s3748_s5 + $0x58] sm:$0xff]  }
 0x181   :  { %2055 = vmatprep.subr.bf16.mxu1 %v2986_v40  ;;  %v406_v40 = vld [vmem:[#allocation2 + $0x6f0] sm:$0xff] }
 0x182   :  { %v3047_v52 = vcombine.low %v402_v39, %v406_v40  ;;  %v3284_v33 = vld [vmem:[%s3748_s5 + $0x10] sm:$0xff]  }
 0x183   :  { %1974 = vmatpush1.bf16.msra.mxu0 %v2983_v50  ;;  %v3048_v50 = vcombine.high %v402_v39, %v406_v40  ;;  %v3285_v34 = vld [vmem:[%s3748_s5 + $0x90] sm:$0xff]   ;;  %v3291_v39 = vld [vmem:[%s3748_s5 + $0xe0] sm:$0xff]  }
 0x184   :  { %2056 = vmatpush1.bf16.msra.mxu1 %v2985_v47  ;;  %1975 = vmatprep.subr.bf16.mxu0 %v2992_v48  ;;  %v3050_v47 = vcombine.high %v403_v42, %v407_v44  ;;  %v410_v48 = vld [vmem:[#allocation2 + $0x710] sm:$0xff]  ;;  %v3292_v40 = vld [vmem:[%s3748_s5 + $0x20] sm:$0xff]   ;;  %v3294_v44 = vld [vmem:[%s3748_s5 + $0x68] sm:$0xff]  }
 0x185   :  { %2057 = vmatprep.subr.bf16.mxu1 %v2994_v18  ;;  %v414_v18 = vld [vmem:[#allocation2 + $0x730] sm:$0xff]  ;;  %v3293_v42 = vld [vmem:[%s3748_s5 + $0xa0] sm:$0xff]  }
 0x186   :  { %v3055_v59 = vcombine.low %v410_v48, %v414_v18 }
 0x187   :  { %1976 = vmatpush1.bf16.msra.mxu0 %v2991_v54  ;;  %v3056_v54 = vcombine.high %v410_v48, %v414_v18  ;;  %v3299_v48 = vld [vmem:[%s3748_s5 + $0xf0] sm:$0xff]  }
 0x188   :  { %2058 = vmatpush1.bf16.msra.mxu1 %v2993_v55  ;;  %1977 = vmatprep.subr.bf16.mxu0 %v3000_v56  ;;  %v3058_v55 = vcombine.high %v411_v49, %v415_v51  ;;  %v418_v56 = vld [vmem:[#allocation2 + $0x750] sm:$0xff]  ;;  %v3302_v51 = vld [vmem:[%s3748_s5 + $0x78] sm:$0xff]  }
 0x189   :  { %2059 = vmatprep.subr.bf16.mxu1 %v3002_v57  ;;  %v422_v57 = vld [vmem:[#allocation2 + $0x770] sm:$0xff] }
 0x18a   :  { %v3063_v4 = vcombine.low %v418_v56, %v422_v57  ;;  %v3300_v18 = vld [vmem:[%s3748_s5 + $0x30] sm:$0xff]  }
 0x18b   :  { %1978 = vmatpush1.bf16.msra.mxu0 %v2999_v62  ;;  %v3064_v62 = vcombine.high %v418_v56, %v422_v57  ;;  %v3301_v49 = vld [vmem:[%s3748_s5 + $0xb0] sm:$0xff]   ;;  %v3307_v56 = vld [vmem:[%s3748_s5 + $0x1c0] sm:$0xff]  }
 0x18c   :  { %2060 = vmatpush1.bf16.msra.mxu1 %v3001_v63  ;;  %1979 = vmatprep.subr.bf16.mxu0 %v3008_v0  ;;  %v3066_v63 = vcombine.high %v419_v29, %v423_v58  ;;  %v426_v0 = vld [vmem:[#allocation2 + $0x790] sm:$0xff]  ;;  %v3616_v57 = vld [vmem:[%s3747_s4] sm:$0xff] }
 0x18d   :  { %2061 = vmatprep.subr.bf16.mxu1 %v3010_v1  ;;  %v430_v1 = vld [vmem:[#allocation2 + $0x7b0] sm:$0xff]  ;;  %v445_v29 = vrot.slane %v3616_v57, %v52_v17  ;;  %v453_v58 = vrot.slane %v3616_v57, %v60_v25 }
 0x18e   :  { %v3071_v12 = vcombine.low %v426_v0, %v430_v1 }
 0x18f   :  { %1980 = vmatpush1.bf16.msra.mxu0 %v3007_v6  ;;  %v3072_v6 = vcombine.high %v426_v0, %v430_v1 }
 0x190   :  { %2062 = vmatpush1.bf16.msra.mxu1 %v3009_v7  ;;  %1981 = vmatprep.subr.bf16.mxu0 %v3016_v8  ;;  %v3074_v7 = vcombine.high %v427_v2, %v431_v3  ;;  %v434_v8 = vld [vmem:[#allocation2 + $0x7d0] sm:$0xff] }
 0x191   :  { %2063 = vmatprep.subr.bf16.mxu1 %v3018_v9  ;;  %v438_v9 = vld [vmem:[#allocation2 + $0x7f0] sm:$0xff] }
 0x193   :  { %1982 = vmatpush1.bf16.msra.mxu0 %v3015_v14  ;;  %v3080_v14 = vcombine.high %v434_v8, %v438_v9 }
 0x194   :  { %2064 = vmatpush1.bf16.msra.mxu1 %v3017_v15  ;;  %1983 = vmatprep.subr.bf16.mxu0 %v3024_v21  ;;  %v3082_v15 = vcombine.high %v435_v10, %v439_v11  ;;  %v3079_v21 = vcombine.low %v434_v8, %v438_v9 }
 0x195   :  { %2065 = vmatprep.subr.bf16.mxu1 %v3026_v22  ;;  %v3081_v22 = vcombine.low %v435_v10, %v439_v11 }
 0x197   :  { %1984 = vmatpush1.bf16.msra.mxu0 %v3023_v41  ;;  %v3278_v41 = vld [vmem:[%s3748_s5 + $0x48] sm:$0xff]  }
 0x198   :  { %2066 = vmatpush1.bf16.msra.mxu1 %v3025_v28  ;;  %1985 = vmatprep.subr.bf16.mxu0 %v3032_v30  ;;  %v3279_v28 = vld [vmem:[%s3748_s5 + $0xc8] sm:$0xff]  }
 0x199   :  { %2067 = vmatprep.subr.bf16.mxu1 %v3034_v31  ;;  %v3280_v30 = vld [vmem:[%s3748_s5 + $0x8] sm:$0xff]  }
 0x19a   :  { %v3281_v31 = vld [vmem:[%s3748_s5 + $0x88] sm:$0xff]  }
 0x19b   :  { %1986 = vmatpush1.bf16.msra.mxu0 %v3031_v36  ;;  %v3287_v36 = vld [vmem:[%s3748_s5 + $0xd8] sm:$0xff]  }
 0x19c   :  { %2068 = vmatpush1.bf16.msra.mxu1 %v3033_v37  ;;  %1987 = vmatprep.subr.bf16.mxu0 %v3040_v38  ;;  %v3288_v37 = vld [vmem:[%s3748_s5 + $0x18] sm:$0xff]  }
 0x19d   :  { %2069 = vmatprep.subr.bf16.mxu1 %v3042_v43  ;;  %v3289_v38 = vld [vmem:[%s3748_s5 + $0x98] sm:$0xff]   ;;  %v3290_v43 = vld [vmem:[%s3748_s5 + $0x60] sm:$0xff]  }
 0x19f   :  { %1988 = vmatpush1.bf16.msra.mxu0 %v3039_v45  ;;  %v3295_v45 = vld [vmem:[%s3748_s5 + $0xe8] sm:$0xff]  }
 0x1a0   :  { %2070 = vmatpush1.bf16.msra.mxu1 %v3041_v46  ;;  %1989 = vmatprep.subr.bf16.mxu0 %v3048_v50  ;;  %v3296_v46 = vld [vmem:[%s3748_s5 + $0x28] sm:$0xff]  }
 0x1a1   :  { %2071 = vmatprep.subr.bf16.mxu1 %v3050_v47  ;;  %v3297_v50 = vld [vmem:[%s3748_s5 + $0xa8] sm:$0xff]   ;;  %v3298_v47 = vld [vmem:[%s3748_s5 + $0x70] sm:$0xff]  }
 0x1a3   :  { %1990 = vmatpush1.bf16.msra.mxu0 %v3047_v52  ;;  %v3303_v52 = vld [vmem:[%s3748_s5 + $0xf8] sm:$0xff]  }
 0x1a4   :  { %2072 = vmatpush1.bf16.msra.mxu1 %v3049_v53  ;;  %1991 = vmatprep.subr.bf16.mxu0 %v3056_v54  ;;  %v3304_v53 = vld [vmem:[%s3748_s5 + $0x38] sm:$0xff]  }
 0x1a5   :  { %2073 = vmatprep.subr.bf16.mxu1 %v3058_v55  ;;  %v3305_v54 = vld [vmem:[%s3748_s5 + $0xb8] sm:$0xff]   ;;  %v3306_v55 = vld [vmem:[%s3748_s5 + $0x140] sm:$0xff]  }
 0x1a7   :  { %1992 = vmatpush1.bf16.msra.mxu0 %v3055_v59  ;;  %v449_v59 = vrot.slane %v3616_v57, %v56_v19 }
 0x1a8   :  { %2074 = vmatpush1.bf16.msra.mxu1 %v3057_v61  ;;  %1993 = vmatprep.subr.bf16.mxu0 %v3064_v62  ;;  %v457_v61 = vrot.slane %v3616_v57, %v64_v20  ;;  %v3308_v20 = vld [vmem:[%s3748_s5 + $0x100] sm:$0xff]  }
 0x1a9   :  { %2075 = vmatprep.subr.bf16.mxu1 %v3066_v63 }
 0x1ab   :  { %1994 = vmatpush1.bf16.msra.mxu0 %v3063_v4 }
 0x1ac   :  { %2076 = vmatpush1.bf16.msra.mxu1 %v3065_v5  ;;  %1995 = vmatprep.subr.bf16.mxu0 %v3072_v6 }
 0x1ad   :  { %2077 = vmatprep.subr.bf16.mxu1 %v3074_v7 }
 0x1af   :  { %1996 = vmatpush1.bf16.msra.mxu0 %v3071_v12 }
 0x1b0   :  { %2078 = vmatpush1.bf16.msra.mxu1 %v3073_v13  ;;  %1997 = vmatprep.subr.bf16.mxu0 %v3080_v14  ;;  %v3309_v13 = vld [vmem:[%s3748_s5 + $0x180] sm:$0xff]  }
 0x1b1   :  { %2079 = vmatprep.subr.bf16.mxu1 %v3082_v15 }
 0x1b3   :  { %1998 = vmatpush1.bf16.msra.mxu0 %v3079_v21  ;;  %v3310_v21 = vld [vmem:[%s3748_s5 + $0x148] sm:$0xff]  }
 0x1b4   :  { %2080 = vmatpush1.bf16.msra.mxu1 %v3081_v22  ;;  %3148 = vmatprep.subr.bf16.mxu0 %v3274_v23  ;;  %v3311_v22 = vld [vmem:[%s3748_s5 + $0x1c8] sm:$0xff]  }
 0x1b5   :  { %3170 = vmatprep.subr.bf16.mxu1 %v3275_v24  ;;  %v3312_v23 = vld [vmem:[%s3748_s5 + $0x108] sm:$0xff]  }
 0x1b6   :  { %2000 = vmatmul.mubr.bf16.vlgmr.msra.gmra.mrb[8].mxu0 %v3499_v60  ;;  %v3313_v24 = vld [vmem:[%s3748_s5 + $0x188] sm:$0xff]  }
 0x1b7   :  { %2082 = vmatmul.mubr.bf16.vlgmr.msra.gmra.mrb[8].mxu1 %v3499_v60  ;;  %3149 = vmatpush3.bf16.msra.mxu0 %v3276_v26  ;;  %v3283_v60 = vld [vmem:[%s3748_s5 + $0xd0] sm:$0xff]  }
 0x1b8   :  { %3171 = vmatpush3.bf16.msra.mxu1 %v3277_v27  ;;  %3150 = vmatprep.subr.bf16.mxu0 %v3278_v41  ;;  %v3314_v26 = vld [vmem:[%s3748_s5 + $0x150] sm:$0xff]  }
 0x1b9   :  { %3172 = vmatprep.subr.bf16.mxu1 %v3279_v28  ;;  %v3315_v27 = vld [vmem:[%s3748_s5 + $0x1d0] sm:$0xff]  }
 0x1ba   :  { %v3316_v41 = vld [vmem:[%s3748_s5 + $0x110] sm:$0xff]  }
 0x1bb   :  { %3151 = vmatpush3.bf16.msra.mxu0 %v3280_v30  ;;  %v3317_v28 = vld [vmem:[%s3748_s5 + $0x190] sm:$0xff]   ;;  %v3318_v30 = vld [vmem:[%s3748_s5 + $0x158] sm:$0xff]  }
 0x1bc   :  { %3173 = vmatpush3.bf16.msra.mxu1 %v3281_v31  ;;  %3152 = vmatprep.subr.bf16.mxu0 %v3282_v32  ;;  %v3319_v31 = vld [vmem:[%s3748_s5 + $0x1d8] sm:$0xff]  }
 0x1bd   :  { %3174 = vmatprep.subr.bf16.mxu1 %v3283_v60  ;;  %v3320_v32 = vld [vmem:[%s3748_s5 + $0x118] sm:$0xff]  }
 0x1be   :  { %v3321_v60 = vld [vmem:[%s3748_s5 + $0x198] sm:$0xff]  }
 0x1bf   :  { %3153 = vmatpush3.bf16.msra.mxu0 %v3284_v33  ;;  %v3322_v33 = vld [vmem:[%s3748_s5 + $0x160] sm:$0xff]  }
 0x1c0   :  { %3175 = vmatpush3.bf16.msra.mxu1 %v3285_v34  ;;  %3154 = vmatprep.subr.bf16.mxu0 %v3286_v35  ;;  %v3323_v34 = vld [vmem:[%s3748_s5 + $0x1e0] sm:$0xff]  }
 0x1c1   :  { %3176 = vmatprep.subr.bf16.mxu1 %v3287_v36  ;;  %v3324_v35 = vld [vmem:[%s3748_s5 + $0x120] sm:$0xff]  }
 0x1c2   :  { %v3325_v36 = vld [vmem:[%s3748_s5 + $0x1a0] sm:$0xff]  }
 0x1c3   :  { %3155 = vmatpush3.bf16.msra.mxu0 %v3288_v37  ;;  %v3326_v37 = vld [vmem:[%s3748_s5 + $0x168] sm:$0xff]  }
 0x1c4   :  { %3177 = vmatpush3.bf16.msra.mxu1 %v3289_v38  ;;  %3156 = vmatprep.subr.bf16.mxu0 %v3290_v43  ;;  %v3327_v38 = vld [vmem:[%s3748_s5 + $0x1e8] sm:$0xff]  }
 0x1c5   :  { %3178 = vmatprep.subr.bf16.mxu1 %v3291_v39  ;;  %v3328_v43 = vld [vmem:[%s3748_s5 + $0x128] sm:$0xff]  }
 0x1c6   :  { %v3329_v39 = vld [vmem:[%s3748_s5 + $0x1a8] sm:$0xff]  }
 0x1c7   :  { %3157 = vmatpush3.bf16.msra.mxu0 %v3292_v40  ;;  %v3330_v40 = vld [vmem:[%s3748_s5 + $0x170] sm:$0xff]  }
 0x1c8   :  { %3179 = vmatpush3.bf16.msra.mxu1 %v3293_v42  ;;  %3158 = vmatprep.subr.bf16.mxu0 %v3294_v44  ;;  %v3331_v42 = vld [vmem:[%s3748_s5 + $0x1f0] sm:$0xff]  }
 0x1c9   :  { %3180 = vmatprep.subr.bf16.mxu1 %v3295_v45  ;;  %v3332_v44 = vld [vmem:[%s3748_s5 + $0x130] sm:$0xff]  }
 0x1ca   :  { %v3333_v45 = vld [vmem:[%s3748_s5 + $0x1b0] sm:$0xff]  }
 0x1cb   :  { %3159 = vmatpush3.bf16.msra.mxu0 %v3296_v46  ;;  %v3334_v46 = vld [vmem:[%s3748_s5 + $0x178] sm:$0xff]  }
 0x1cc   :  { %3181 = vmatpush3.bf16.msra.mxu1 %v3297_v50  ;;  %3160 = vmatprep.subr.bf16.mxu0 %v3298_v47  ;;  %v3335_v50 = vld [vmem:[%s3748_s5 + $0x1f8] sm:$0xff]  }
 0x1cd   :  { %3182 = vmatprep.subr.bf16.mxu1 %v3299_v48  ;;  %v3336_v47 = vld [vmem:[%s3748_s5 + $0x138] sm:$0xff]  }
 0x1ce   :  { %v3337_v48 = vld [vmem:[%s3748_s5 + $0x1b8] sm:$0xff]  }
 0x1cf   :  { %3161 = vmatpush3.bf16.msra.mxu0 %v3300_v18  ;;  %v460_v18 = vsub.s32 4, %v3461_v16 }
 0x1d0   :  { %3183 = vmatpush3.bf16.msra.mxu1 %v3301_v49  ;;  %3162 = vmatprep.subr.bf16.mxu0 %v3302_v51  ;;  %v468_v49 = vsub.s32 6, %v3461_v16  ;;  %v464_v51 = vsub.s32 5, %v3461_v16 }
 0x1d1   :  { %3184 = vmatprep.subr.bf16.mxu1 %v3303_v52  ;;  %v472_v52 = vsub.s32 7, %v3461_v16 }
 0x1d3   :  { %3163 = vmatpush3.bf16.msra.mxu0 %v3304_v53  ;;  %v461_v53 = vrot.slane %v3616_v57, %v460_v18 }
 0x1d4   :  { %3185 = vmatpush3.bf16.msra.mxu1 %v3305_v54  ;;  %3192 = vmatprep.subr.bf16.mxu0 %v3306_v55  ;;  %v469_v54 = vrot.slane %v3616_v57, %v468_v49  ;;  %v465_v55 = vrot.slane %v3616_v57, %v464_v51 }
 0x1d5   :  { %3214 = vmatprep.subr.bf16.mxu1 %v3307_v56  ;;  %v473_v56 = vrot.slane %v3616_v57, %v472_v52 }
 0x209   :  { %v1837_v62 = vpop.f32.mrb[4].mxu0  ;;  %v1919_v63 = vpop.f32.mrb[4].mxu1 }
 0x20a   :  { %v3236_v0 = vadd.f32 %v1837_v62, %v445_v29  ;;  %v3238_v1 = vadd.f32 %v1919_v63, %v453_v58  ;;  %v1839_v2 = vpop.f32.mrb[5].mxu0  ;;  %v1921_v3 = vpop.f32.mrb[5].mxu1 }
 0x20b   :  { %v3237_v4 = vadd.f32 %v1839_v2, %v449_v59  ;;  %v3239_v17 = vadd.f32 %v1921_v3, %v457_v61  ;;  %v1841_v5 = vpop.f32.mrb[6].mxu0  ;;  %v1923_v6 = vpop.f32.mrb[6].mxu1 }
 0x20c   :  { %v2090_v7 = vmax.f32 %v3236_v0, 0.0  ;;  %v2092_v25 = vmax.f32 %v3238_v1, 0.0  ;;  %v1842_v8 = vpop.f32.mrb[7].mxu0  ;;  %v1924_v9 = vpop.f32.mrb[7].mxu1 }
 0x20d   :  { %v2091_v10 = vmax.f32 %v3237_v4, 0.0  ;;  %v2093_v19 = vmax.f32 %v3239_v17, 0.0 }
 0x20e   :  { %v2098_v14 = vpack.c.bf16 %v2090_v7, %v2090_v7  ;;  %v2100_v15 = vpack.c.bf16 %v2092_v25, %v2092_v25 }
 0x20f   :  { %v2099_v11 = vpack.c.bf16 %v2091_v10, %v2091_v10  ;;  %v2101_v12 = vpack.c.bf16 %v2093_v19, %v2093_v19 }
 0x211   :  { %2657 = vmatprep.mubr.bf16.mxu0 %v2099_v11  ;;  %2697 = vmatprep.mubr.bf16.mxu1 %v2101_v12  ;;  %v3083_v11 = vld [vmem:[%s3749_s6] ss:$0 sm:$0xff]  ;;  %s3390_s6 = smov 127  }
 0x212   :  { %2658 = vmatmul.mubr.bf16.vlgmr.msra.gmra.mrb[12].mxu0 %v2098_v14  ;;  %2698 = vmatmul.mubr.bf16.vlgmr.msra.gmra.mrb[12].mxu1 %v2100_v15 }
 0x213   :  { %3193 = vmatpush3.bf16.msra.mxu0 %v3308_v20  ;;  %3215 = vmatpush3.bf16.msra.mxu1 %v3309_v13 }
 0x214   :  { %3194 = vmatprep.subr.bf16.mxu0 %v3310_v21  ;;  %3216 = vmatprep.subr.bf16.mxu1 %v3311_v22 }
 0x217   :  { %3195 = vmatpush3.bf16.msra.mxu0 %v3312_v23  ;;  %3217 = vmatpush3.bf16.msra.mxu1 %v3313_v24 }
 0x218   :  { %3196 = vmatprep.subr.bf16.mxu0 %v3314_v26  ;;  %3218 = vmatprep.subr.bf16.mxu1 %v3315_v27 }
 0x21b   :  { %3197 = vmatpush3.bf16.msra.mxu0 %v3316_v41  ;;  %3219 = vmatpush3.bf16.msra.mxu1 %v3317_v28 }
 0x21c   :  { %3198 = vmatprep.subr.bf16.mxu0 %v3318_v30  ;;  %3220 = vmatprep.subr.bf16.mxu1 %v3319_v31 }
 0x21f   :  { %3199 = vmatpush3.bf16.msra.mxu0 %v3320_v32  ;;  %3221 = vmatpush3.bf16.msra.mxu1 %v3321_v60 }
 0x220   :  { %3200 = vmatprep.subr.bf16.mxu0 %v3322_v33  ;;  %3222 = vmatprep.subr.bf16.mxu1 %v3323_v34 }
 0x223   :  { %3201 = vmatpush3.bf16.msra.mxu0 %v3324_v35  ;;  %3223 = vmatpush3.bf16.msra.mxu1 %v3325_v36 }
 0x224   :  { %3202 = vmatprep.subr.bf16.mxu0 %v3326_v37  ;;  %3224 = vmatprep.subr.bf16.mxu1 %v3327_v38 }
 0x227   :  { %3203 = vmatpush3.bf16.msra.mxu0 %v3328_v43  ;;  %3225 = vmatpush3.bf16.msra.mxu1 %v3329_v39 }
 0x228   :  { %3204 = vmatprep.subr.bf16.mxu0 %v3330_v40  ;;  %3226 = vmatprep.subr.bf16.mxu1 %v3331_v42 }
 0x22b   :  { %3205 = vmatpush3.bf16.msra.mxu0 %v3332_v44  ;;  %3227 = vmatpush3.bf16.msra.mxu1 %v3333_v45 }
 0x22c   :  { %3206 = vmatprep.subr.bf16.mxu0 %v3334_v46  ;;  %3228 = vmatprep.subr.bf16.mxu1 %v3335_v50 }
 0x22f   :  { %3207 = vmatpush3.bf16.msra.mxu0 %v3336_v47  ;;  %3229 = vmatpush3.bf16.msra.mxu1 %v3337_v48 }
 0x289   :  { %v2001_v29 = vpop.f32.mrb[8].mxu0 }
 0x28a   :  { %v3240_v58 = vadd.f32 %v2001_v29, %v461_v53  ;;  %v2083_v59 = vpop.f32.mrb[8].mxu1  ;;  %v2003_v61 = vpop.f32.mrb[9].mxu0 }
 0x28b   :  { %v3242_v62 = vadd.f32 %v2083_v59, %v469_v54  ;;  %v3241_v63 = vadd.f32 %v2003_v61, %v465_v55  ;;  %v2085_v0 = vpop.f32.mrb[9].mxu1  ;;  %v2005_v1 = vpop.f32.mrb[10].mxu0 }
 0x28c   :  { %v2094_v2 = vmax.f32 %v3240_v58, 0.0  ;;  %v3243_v3 = vadd.f32 %v2085_v0, %v473_v56  ;;  %v2087_v4 = vpop.f32.mrb[10].mxu1  ;;  %v2006_v16 = vpop.f32.mrb[11].mxu0 }
 0x28d   :  { %v2096_v17 = vmax.f32 %v3242_v62, 0.0  ;;  %v2095_v5 = vmax.f32 %v3241_v63, 0.0  ;;  %v2088_v6 = vpop.f32.mrb[11].mxu1 }
 0x28e   :  { %v2097_v7 = vmax.f32 %v3243_v3, 0.0  ;;  %v2102_v8 = vpack.c.bf16 %v2094_v2, %v2094_v2 }
 0x28f   :  { %v2103_v25 = vpack.c.bf16 %v2095_v5, %v2095_v5  ;;  %v2104_v57 = vpack.c.bf16 %v2096_v17, %v2096_v17 }
 0x290   :  { %v2105_v9 = vpack.c.bf16 %v2097_v7, %v2097_v7 }
 0x291   :  { %2737 = vmatprep.mubr.bf16.mxu0 %v2103_v25 }
 0x292   :  { %2777 = vmatprep.mubr.bf16.mxu1 %v2105_v9  ;;  %2738 = vmatmul.mubr.bf16.vlgmr.msra.gmra.mrb[16].mxu0 %v2102_v8 }
 0x293   :  { %2778 = vmatmul.mubr.bf16.vlgmr.msra.gmra.mrb[16].mxu1 %v2104_v57 }
 0x2e5   :  { %v3164_v10 = vpop.f32.mrb[12].mxu0  ;;  %v3186_v19 = vpop.f32.mrb[12].mxu1 }
 0x2e6   :  { %v3165_v12 = vpop.f32.mrb[13].mxu0  ;;  %v3187_v20 = vpop.f32.mrb[13].mxu1 }
 0x2e7   :  { %v3166_v13 = vadd.f32 %v3165_v12, %v3164_v10  ;;  %v3188_v14 = vadd.f32 %v3187_v20, %v3186_v19  ;;  %v3167_v15 = vpop.f32.mrb[14].mxu0  ;;  %v3189_v21 = vpop.f32.mrb[14].mxu1 }
 0x2e8   :  { %v3168_v22 = vpop.f32.mrb[15].mxu0  ;;  %v3190_v23 = vpop.f32.mrb[15].mxu1 }
 0x2e9   :  { %v2660_v24 = vadd.f32 %v3166_v13, %v3083_v11 }
 0x2eb   :  { %v2700_v26 = vadd.f32 %v3188_v14, %v2660_v24 }
 0x365   :  { %v3208_v27 = vpop.f32.mrb[16].mxu0 }
 0x366   :  { %v3230_v41 = vpop.f32.mrb[16].mxu1  ;;  %v3209_v28 = vpop.f32.mrb[17].mxu0 }
 0x367   :  { %v3210_v30 = vadd.f32 %v3209_v28, %v3208_v27  ;;  %v3231_v31 = vpop.f32.mrb[17].mxu1  ;;  %v3211_v32 = vpop.f32.mrb[18].mxu0 }
 0x368   :  { %v3232_v60 = vadd.f32 %v3231_v31, %v3230_v41  ;;  %v3233_v33 = vpop.f32.mrb[18].mxu1  ;;  %v3212_v34 = vpop.f32.mrb[19].mxu0 }
 0x369   :  { %v2740_v35 = vadd.f32 %v3210_v30, %v2700_v26  ;;  %v3234_v36 = vpop.f32.mrb[19].mxu1 }
 0x36b   :  { %v2780_v37 = vadd.f32 %v3232_v60, %v2740_v35 }
 0x36d   :  { %2787 = vperm.xlu1 %3266, %v2780_v37   ;;  %2791 = vrot.lane.b32.xlu0 %v2780_v37, %s3390_s6 }
 0x3df   :  { %v2792_v38 = vpop.permute.xlu0 %2791 }
 0x3e0   :  { %v2795_v43 = vsel %vm2794_vm1, %v2792_v38, 0.0 }
 0x3e1   :  { %2796 = vadd.xlane.f32.xlu0 %v2795_v43 }
 0x3ec   :  { %v2788_v39 = vpop.permute.xlu1 %2787 }
 0x3ed   :  { %v2790_v42 = vadd.f32 %v2788_v39, %v2780_v37 }
 0x46e   :  { %v2797_v40 = vpop.xlane.xlu0 %2796 }
 0x46f   :  { %v2799_v44 = vmul.f32 0.125, %v2797_v40 }
 0x471   :  { %v2800_v45 = vsub.f32 %v2790_v42, %v2799_v44 }
 0x473   :  { %2802 = vrot.lane.b32.xlu1 %v2800_v45, %s3390_s6 }
 0x4e5   :  { %v2803_v46 = vpop.permute.xlu1 %2802 }
 0x4e6   :  { %2805 = vst.msk [vmem:[#allocation5] sm:$0x3] %vm2794_vm1, %v2803_v46 }
 0x4e7   :  { %3371 = shalt.err (!%p3368_p12)
}
 0x4e8   :  { %s3372_s0 = scalar_lea.hbm %s3750_s7, 32 }
 0x4e9   :  { %p3373_p13 = scmp.ne.s32.totalorder %s3750_s7, %s3372_s0  ;;  %p3376_p0 = scmp.lt.u32.totalorder %s3372_s0, %s3750_s7 }
 0x4eb   :  { %p3378_p1 = pnand %p3376_p0, %p3373_p13 }
 0x4ed   :  { %3381 = shalt.err (!%p3378_p1)
}
 0x4ee   :  { %2815 = dma.vmem_to_hbm [thread:$0]  %s2813_s3, 32, %s3750_s7, [#allocation4]  }
 0x4ef   :  { %3384 = dma.done.wait [#allocation4], 32  }
 0x4f0   :  { %3385 = vsyncadd [#allocation4], 4294967264 }
 0x4f1   :  { %2819 = vsyncpa [#allocation3], 1 }
 0x4f2   :  { %2820 = vsyncpa [#allocation4], 1 }

</bundles_post_ra>
